<compile_context>
chip_gen: v5e
topology: v5e:2x2
jax: 0.10.0
libtpu: 0.0.40
codegen_flags: <defaults>
</compile_context>

<pallas_src>
import functools

import jax
import jax.numpy as jnp
from jax.experimental import pallas as pl
from jax.experimental.pallas import tpu as pltpu

D = 16             # embedding dim — fixed by the .view(-1, 1, 16, 16) in torch
DEFAULT_TE = 4096  # edges per grid step; ~9 MiB VMEM incl. double-buffering


def _edge_outer_kernel(src_ref, dst_ref, out_ref):
    # src_ref/dst_ref: VMEM (TE, D) gathered node rows for this edge block
    # out_ref:         VMEM (TE, D*D) lane-dense outer products
    s = src_ref[...]                     # (TE, D)
    d = dst_ref[...]                     # (TE, D)
    # Lane-dense outer product: out[e, j*D + k] = s[e, j] * d[e, k]
    sj = jnp.repeat(s, D, axis=1)        # (TE, D*D): lane j*D+k carries s[e, j]
    dk = jnp.tile(d, (1, D))             # (TE, D*D): lane j*D+k carries d[e, k]
    out_ref[...] = (sj * dk).astype(out_ref.dtype)


def _round_up(x, m):
    return ((x + m - 1) // m) * m


@functools.partial(jax.jit, static_argnames=("block_edges",))
def edge_encoder(z, edge_label_index, *, block_edges=DEFAULT_TE):
    """JAX/Pallas equivalent of EdgeEncoder.forward."""
    n, dd = z.shape
    assert dd == D, "EdgeEncoder requires 16-dim node embeddings (view to 16x16)"
    e = edge_label_index.shape[1]
    out_dtype = z.dtype
    if e == 0:
        return jnp.zeros((0, 1, D, D), out_dtype)

    # Block edges; pad the (cheap, int32) index array rather than the gathered
    # f32 rows so the ragged tail costs no extra HBM pass. Padded rows gather
    # node 0 and are sliced off below.
    te = min(block_edges, _round_up(e, 8))
    e_pad = _round_up(e, te)

    idx = edge_label_index.astype(jnp.int32)
    if e_pad != e:
        idx = jnp.pad(idx, ((0, 0), (0, e_pad - e)))

    # TODO(synk): torch raises on out-of-range indices; jnp.take clamps silently.
    src = jnp.take(z, idx[0], axis=0)    # (E_pad, D)
    dst = jnp.take(z, idx[1], axis=0)    # (E_pad, D)

    out = pl.pallas_call(
        _edge_outer_kernel,
        out_shape=jax.ShapeDtypeStruct((e_pad, D * D), out_dtype),
        grid=(e_pad // te,),
        in_specs=[
            pl.BlockSpec((te, D), lambda i: (i, 0)),
            pl.BlockSpec((te, D), lambda i: (i, 0)),
        ],
        out_specs=pl.BlockSpec((te, D * D), lambda i: (i, 0)),
        compiler_params=pltpu.CompilerParams(
            dimension_semantics=("parallel",)),
    )(src, dst)

    return out[:e].reshape(e, 1, D, D)


if __name__ == "__main__":
    key = jax.random.PRNGKey(0)
    kz, ke = jax.random.split(key)

    num_nodes, num_edges = 12, 37
    z = jax.random.normal(kz, (num_nodes, D), dtype=jnp.float32)
    edge_label_index = jax.random.randint(
        ke, (2, num_edges), 0, num_nodes, dtype=jnp.int32)

    # plain-JAX reference for the torch forward
    src = z[edge_label_index[0]]
    dst = z[edge_label_index[1]]
    ref = jnp.einsum('ij,ik->ijk', src, dst).reshape(-1, 1, D, D)

    # Default path: single edge block (te rounded up to multiple of 8).
    out = jax.block_until_ready(edge_encoder(z, edge_label_index))
    assert out.shape == (num_edges, 1, D, D), out.shape
    assert out.dtype == jnp.float32
    assert jnp.allclose(out, ref, atol=1e-5, rtol=1e-5)

    # Multi-block path with a ragged tail (exercises grid iteration + index padding).
    out_blocked = jax.block_until_ready(
        edge_encoder(z, edge_label_index, block_edges=16))
    assert out_blocked.shape == (num_edges, 1, D, D)
    assert jnp.allclose(out_blocked, ref, atol=1e-5, rtol=1e-5)

    print("KERNEL_OK")
</pallas_src>

<mosaic_0001>
module attributes {stable_mosaic.version = 11 : i64} {
  func.func @_edge_outer_kernel(%arg0: i32, %arg1: memref<40x16xf32, #tpu.memory_space<vmem>>, %arg2: memref<40x16xf32, #tpu.memory_space<vmem>>, %arg3: memref<40x256xf32, #tpu.memory_space<vmem>>) attributes {dimension_semantics = [#tpu.dimension_semantics<parallel>], iteration_bounds = array<i64: 1>, scalar_prefetch = 0 : i64, scratch_operands = 0 : i64, tpu.core_type = #tpu.core_type<tc>, window_params = [{transform_indices = @transform_0, window_bounds = array<i64: 40, 16>}, {transform_indices = @transform_1, window_bounds = array<i64: 40, 16>}, {transform_indices = @transform_2, window_bounds = array<i64: 40, 256>}]} {
    %c0 = arith.constant 0 : index
    %c0_0 = arith.constant 0 : index
    %0 = vector.load %arg1[%c0, %c0_0] : memref<40x16xf32, #tpu.memory_space<vmem>>, vector<40x16xf32>
    %c0_1 = arith.constant 0 : index
    %c0_2 = arith.constant 0 : index
    %1 = vector.load %arg2[%c0_1, %c0_2] : memref<40x16xf32, #tpu.memory_space<vmem>>, vector<40x16xf32>
    %2 = vector.shape_cast %0 : vector<40x16xf32> to vector<40x16x1xf32>
    %3 = vector.broadcast %2 : vector<40x16x1xf32> to vector<40x16x16xf32>
    %4 = vector.shape_cast %3 : vector<40x16x16xf32> to vector<40x256xf32>
    %5 = tpu.concatenate %1, %1, %1, %1, %1, %1, %1, %1, %1, %1, %1, %1, %1, %1, %1, %1 in 1 : vector<40x16xf32>, vector<40x16xf32>, vector<40x16xf32>, vector<40x16xf32>, vector<40x16xf32>, vector<40x16xf32>, vector<40x16xf32>, vector<40x16xf32>, vector<40x16xf32>, vector<40x16xf32>, vector<40x16xf32>, vector<40x16xf32>, vector<40x16xf32>, vector<40x16xf32>, vector<40x16xf32>, vector<40x16xf32> -> vector<40x256xf32>
    %6 = arith.mulf %4, %5 : vector<40x256xf32>
    %c0_3 = arith.constant 0 : index
    %c0_4 = arith.constant 0 : index
    %7 = vector.load %arg3[%c0_3, %c0_4] : memref<40x256xf32, #tpu.memory_space<vmem>>, vector<40x256xf32>
    tpu.vector_store %arg3[%c0_3, %c0_4], %6 {strides = array<i32>} : memref<40x256xf32, #tpu.memory_space<vmem>>, vector<40x256xf32>,
    return
  }
  func.func @transform_0(%arg0: i32) -> (i32, i32) {
    %c0_i32 = arith.constant 0 : i32
    %c0_i32_0 = arith.constant 0 : i32
    return %arg0, %c0_i32 : i32, i32
  }
  func.func @transform_1(%arg0: i32) -> (i32, i32) {
    %c0_i32 = arith.constant 0 : i32
    %c0_i32_0 = arith.constant 0 : i32
    return %arg0, %c0_i32 : i32, i32
  }
  func.func @transform_2(%arg0: i32) -> (i32, i32) {
    %c0_i32 = arith.constant 0 : i32
    %c0_i32_0 = arith.constant 0 : i32
    return %arg0, %c0_i32 : i32, i32
  }
}

</mosaic_0001>

<bundles_post_ra>
// kernel: edge_encoder.1
= control target key start
LH: loop header
LB: loop body
LE: loop exit
PB: predicated region body
PF: predicated region fallthrough
CT: control target
= control target key end

     0   :  { %v22_v0 = vlaneseq  ;;  %v2234_v46 = vmov 1983009808   ;;  %vm542_vm0 = vcmask 1047556   ;;  %v2235_v62 = vmov 1934713408   ;;  %s2237_s19 = smov 32   ;;  %s3758_s0 = inlined_call_operand.vmem [shape: f32[40,16], index: 0, kind: input, shape index: {}]   ;;  %s3759_s1 = inlined_call_operand.vmem [shape: f32[40,16], index: 1, kind: input, shape index: {}]   ;;  %s3760_s2 = inlined_call_operand.vmem [shape: f32[40,256], index: 2, kind: output, shape index: {}]  }
   0x1   :  { %v11_v3 = vld [vmem:[%s3758_s0] sm:$0xff]  ;;  %v2274_v8 = vld [vmem:[%s3758_s0 + $0x8] sm:$0xff]  ;;  %v2280_v10 = vld [vmem:[%s3758_s0 + $0x10] sm:$0xff]  ;;  %v547_v47 = vunpack.c.l.s4 %v2234_v46  ;;  %v595_v63 = vunpack.c.l.s4 %v2235_v62  ;;  %s2238_s20 = smov 48   ;;  %vm1942_vm1 = vcmask 130048   ;;  %vm1948_vm2 = vcmask 261120  }
   0x2   :  { %v2258_v1 = vshrl.u32 %v22_v0, 7  ;;  %v47_v4 = vperm.slane %v11_v3, 2  ;;  %v34_v5 = vperm.slane %v11_v3, 1  ;;  %v21_v6 = vperm.slane %v11_v3, 0  ;;  %v2293_v14 = vld [vmem:[%s3758_s0 + $0x18] sm:$0xff]  ;;  %v2305_v19 = vld [vmem:[%s3758_s0 + $0x20] sm:$0xff] }
   0x3   :  { %v99_v7 = vperm.slane %v11_v3, 6  ;;  %v164_v9 = vperm.slane %v2274_v8, 3  ;;  %v60_v11 = vperm.slane %v11_v3, 3  ;;  %v229_v12 = vperm.slane %v2280_v10, 0  ;;  %s2236_s0 = smov 16   ;;  %s2239_s21 = smov 64  }
   0x4   :  { %2199 = vset.pattern.permute.xlu2 %v2258_v1  ;;  %2198 = vset.pattern.permute.xlu1 %v2258_v1  ;;  %v2263_v2 = vadd.s32 8, %v2258_v1  ;;  %v294_v13 = vperm.slane %v2280_v10, 5  ;;  %v86_v15 = vperm.slane %v11_v3, 5  ;;  %v359_v16 = vperm.slane %v2293_v14, 2  ;;  %s2240_s22 = smov 80   ;;  %s2241_s23 = smov 96  }
   0x5   :  { %v73_v17 = vperm.slane %v11_v3, 4  ;;  %v3762_v18 = vperm.slane %v2293_v14, 7  ;;  %v3761_v20 = vperm.slane %v2305_v19, 4  ;;  %v112_v21 = vperm.slane %v11_v3, 7  ;;  %s2242_s24 = smov 112  }
   0x6   :  { %2197 = vset.pattern.permute.xlu0 %v2263_v2  ;;  %v125_v22 = vperm.slane %v2274_v8, 0  ;;  %v151_v23 = vperm.slane %v2274_v8, 2  ;;  %v138_v24 = vperm.slane %v2274_v8, 1  ;;  %v203_v25 = vperm.slane %v2274_v8, 6 }
   0x7   :  { %v177_v26 = vperm.slane %v2274_v8, 4  ;;  %v190_v28 = vperm.slane %v2274_v8, 5  ;;  %v216_v32 = vperm.slane %v2274_v8, 7  ;;  %v268_v34 = vperm.slane %v2280_v10, 3 }
   0x8   :  { %v242_v43 = vperm.slane %v2280_v10, 1  ;;  %v255_v49 = vperm.slane %v2280_v10, 2  ;;  %v2368_v52 = vunpack.c.0.s8 %v547_v47  ;;  %vm1954_vm3 = vcmask 392192  }
   0x9   :  { %vm1960_vm4 = vcmask 523264   ;;  %vm1966_vm5 = vcmask 654336   ;;  %vm1972_vm6 = vcmask 785408   ;;  %vm1978_vm7 = vcmask 916480  }
   0xc   :  { %52 = vperm.xlu2 %2199, %v47_v4   ;;  %39 = vperm.xlu1 %2198, %v34_v5  }
   0xe   :  { %32 = vperm.xlu0 %2197, %v21_v6  }
  0x14   :  { %2202 = vset.pattern.permute.xlu2 %v2263_v2  ;;  %2200 = vset.pattern.permute.xlu1 %v2263_v2 }
  0x16   :  { %110 = vperm.xlu0 %2197, %v99_v7  }
  0x1c   :  { %58 = vperm.xlu2 %2202, %v47_v4   ;;  %45 = vperm.xlu1 %2200, %v34_v5  }
  0x1e   :  { %175 = vperm.xlu0 %2197, %v164_v9  }
  0x24   :  { %71 = vperm.xlu2 %2202, %v60_v11   ;;  %2201 = vset.pattern.permute.xlu1 %v2258_v1 }
  0x26   :  { %240 = vperm.xlu0 %2197, %v229_v12  }
  0x2c   :  { %2204 = vset.pattern.permute.xlu2 %v2258_v1  ;;  %65 = vperm.xlu1 %2201, %v60_v11  }
  0x2e   :  { %305 = vperm.xlu0 %2197, %v294_v13  }
  0x34   :  { %91 = vperm.xlu2 %2204, %v86_v15   ;;  %2203 = vset.pattern.permute.xlu1 %v2263_v2 }
  0x36   :  { %370 = vperm.xlu0 %2197, %v359_v16  }
  0x3c   :  { %104 = vperm.xlu2 %2204, %v99_v7   ;;  %84 = vperm.xlu1 %2203, %v73_v17   ;;  %v2397_v7 = vunpack.c.0.s8 %v595_v63 }
  0x3e   :  { %435 = vperm.xlu0 %2197, %v3762_v18  }
  0x44   :  { %2206 = vset.pattern.permute.xlu2 %v2263_v2  ;;  %97 = vperm.xlu1 %2203, %v86_v15  }
  0x46   :  { %500 = vperm.xlu0 %2197, %v3761_v20  }
  0x4c   :  { %123 = vperm.xlu2 %2206, %v112_v21   ;;  %2205 = vset.pattern.permute.xlu1 %v2258_v1 }
  0x4e   :  { %2229 = vset.pattern.permute.xlu0 %v2258_v1 }
  0x54   :  { %136 = vperm.xlu2 %2206, %v125_v22   ;;  %117 = vperm.xlu1 %2205, %v112_v21   ;;  %v281_v21 = vperm.slane %v2280_v10, 4 }
  0x56   :  { %26 = vperm.xlu0 %2229, %v21_v6  }
  0x5c   :  { %2208 = vset.pattern.permute.xlu2 %v2258_v1  ;;  %130 = vperm.xlu1 %2205, %v125_v22  }
  0x5e   :  { %78 = vperm.xlu0 %2229, %v73_v17  }
  0x64   :  { %156 = vperm.xlu2 %2208, %v151_v23   ;;  %2207 = vset.pattern.permute.xlu1 %v2263_v2 }
  0x66   :  { %143 = vperm.xlu0 %2229, %v138_v24   ;;  %v2322_v27 = vpop.permute.xlu2 %52 }
  0x6c   :  { %169 = vperm.xlu2 %2208, %v164_v9   ;;  %149 = vperm.xlu1 %2207, %v138_v24  }
  0x6e   :  { %208 = vperm.xlu0 %2229, %v203_v25  }
  0x74   :  { %2210 = vset.pattern.permute.xlu2 %v2263_v2  ;;  %162 = vperm.xlu1 %2207, %v151_v23  }
  0x76   :  { %v2329_v31 = vpop.permute.xlu2 %58  ;;  %273 = vperm.xlu0 %2229, %v268_v34  }
  0x77   :  { %3807 = vst [vmem:[#allocation4_spill] sm:$0xff] %v2329_v31  ;;  %v1102_v53 = vrot.slane %v2329_v31, 4 }
  0x7c   :  { %188 = vperm.xlu2 %2210, %v177_v26   ;;  %2209 = vset.pattern.permute.xlu1 %v2258_v1 }
  0x7e   :  { %v2338_v35 = vpop.permute.xlu2 %71  ;;  %v2341_v36 = vpop.permute.xlu1 %39 }
  0x7f   :  { %3809 = vst [vmem:[#allocation6_spill] sm:$0xff] %v2338_v35  ;;  %v1114_v45 = vrot.slane %v2338_v35, 4  ;;  %v556_v23 = vrot.slane %v2341_v36, 4 }
  0x80   :  { %v2325_v29 = vpop.permute.xlu0 %32 }
  0x81   :  { %3805 = vst [vmem:[#allocation2_spill] sm:$0xff] %v2325_v29  ;;  %v1103_v59 = vsel %vm542_vm0, %v1102_v53, %v2325_v29 }
  0x82   :  { %v2391_v4 = vperm.slane %v1103_v59, %v2368_v52 }
  0x84   :  { %201 = vperm.xlu2 %2210, %v190_v28   ;;  %182 = vperm.xlu1 %2209, %v177_v26   ;;  %3818 = vst [vmem:[#allocation15_spill] sm:$0xff] %v2391_v4  ;;  %v541_v26 = vrot.slane %v2322_v27, 4 }
  0x88   :  { %v2327_v30 = vpop.permute.xlu0 %110 }
  0x89   :  { %3806 = vst [vmem:[#allocation3_spill] sm:$0xff] %v2327_v30  ;;  %v1126_v54 = vrot.slane %v2327_v30, 4 }
  0x8c   :  { %2212 = vset.pattern.permute.xlu2 %v2258_v1  ;;  %195 = vperm.xlu1 %2209, %v190_v28  }
  0x8e   :  { %v2347_v38 = vpop.permute.xlu2 %91  ;;  %v2349_v39 = vpop.permute.xlu1 %45 }
  0x8f   :  { %3811 = vst [vmem:[#allocation8_spill] sm:$0xff] %v2349_v39  ;;  %v1115_v51 = vsel %vm542_vm0, %v1114_v45, %v2349_v39 }
  0x90   :  { %v2333_v33 = vpop.permute.xlu0 %175  ;;  %v2374_v56 = vperm.slane %v1115_v51, %v2368_v52 }
  0x91   :  { %3808 = vst [vmem:[#allocation5_spill] sm:$0xff] %v2333_v33 }
  0x92   :  { %3815 = vst [vmem:[#allocation12_spill] sm:$0xff] %v2374_v56  ;;  %v1150_v0 = vrot.slane %v2374_v56, 4 }
  0x94   :  { %221 = vperm.xlu2 %2212, %v216_v32   ;;  %2211 = vset.pattern.permute.xlu1 %v2263_v2  ;;  %v1151_v8 = vsel %vm542_vm0, %v1150_v0, %v2391_v4 }
  0x95   :  { %v2410_v15 = vperm.slane %v1151_v8, %v2397_v7 }
  0x96   :  { %v2354_v42 = vpop.permute.xlu2 %104 }
  0x97   :  { %v566_v0 = vrot.slane %v2354_v42, 4 }
  0x98   :  { %v2343_v37 = vpop.permute.xlu0 %240 }
  0x99   :  { %3810 = vst [vmem:[#allocation7_spill] sm:$0xff] %v2343_v37 }
  0x9c   :  { %234 = vperm.xlu2 %2212, %v229_v12   ;;  %214 = vperm.xlu1 %2211, %v203_v25  }
  0x9e   :  { %v66_v41 = vpop.permute.xlu1 %65 }
  0x9f   :  { %v554_v24 = vrot.slane %v66_v41, 4  ;;  %v557_v28 = vsel %vm542_vm0, %v66_v41, %v556_v23 }
  0xa0   :  { %v2351_v40 = vpop.permute.xlu0 %305  ;;  %v565_v51 = vperm.slane %v557_v28, %v2368_v52 }
  0xa1   :  { %3812 = vst [vmem:[#allocation9_spill] sm:$0xff] %v2351_v40 }
  0xa2   :  { %v602_v62 = vrot.slane %v565_v51, 4 }
  0xa4   :  { %2214 = vset.pattern.permute.xlu2 %v2263_v2  ;;  %227 = vperm.xlu1 %2211, %v216_v32   ;;  %v580_v32 = vrot.slane %v2347_v38, 4 }
  0xa6   :  { %v2364_v50 = vpop.permute.xlu2 %123 }
  0xa7   :  { %3814 = vst [vmem:[#allocation11_spill] sm:$0xff] %v2364_v50  ;;  %v1138_v55 = vrot.slane %v2364_v50, 4 }
  0xa8   :  { %v2357_v44 = vpop.permute.xlu0 %370 }
  0xac   :  { %253 = vperm.xlu2 %2214, %v242_v43   ;;  %2213 = vset.pattern.permute.xlu1 %v2258_v1 }
  0xae   :  { %v2361_v48 = vpop.permute.xlu1 %84  ;;  %v2427_v53 = vpop.permute.xlu2 %136 }
  0xaf   :  { %3813 = vst [vmem:[#allocation10_spill] sm:$0xff] %v2361_v48  ;;  %v1127_v60 = vsel %vm542_vm0, %v1126_v54, %v2361_v48 }
  0xb0   :  { %v2376_v57 = vpop.permute.xlu0 %435  ;;  %v2394_v5 = vperm.slane %v1127_v60, %v2368_v52  ;;  %3821 = vst [vmem:[#allocation18_spill] sm:$0xff] %v2427_v53 }
  0xb2   :  { %3819 = vst [vmem:[#allocation16_spill] sm:$0xff] %v2394_v5 }
  0xb4   :  { %266 = vperm.xlu2 %2214, %v255_v49   ;;  %247 = vperm.xlu1 %2213, %v242_v43  }
  0xb6   :  { %v2378_v58 = vpop.permute.xlu1 %97 }
  0xb7   :  { %3816 = vst [vmem:[#allocation13_spill] sm:$0xff] %v2378_v58  ;;  %v1139_v61 = vsel %vm542_vm0, %v1138_v55, %v2378_v58 }
  0xb8   :  { %v2388_v3 = vperm.slane %v1139_v61, %v2368_v52  ;;  %v2407_v12 = vpop.permute.xlu0 %500 }
  0xba   :  { %3817 = vst [vmem:[#allocation14_spill] sm:$0xff] %v2388_v3  ;;  %v1174_v6 = vrot.slane %v2388_v3, 4 }
  0xbc   :  { %2216 = vset.pattern.permute.xlu2 %v2258_v1  ;;  %260 = vperm.xlu1 %2213, %v255_v49   ;;  %v1175_v9 = vsel %vm542_vm0, %v1174_v6, %v2394_v5  ;;  %v555_v49 = vsel %vm542_vm0, %v554_v24, %v2341_v36 }
  0xbd   :  { %v2405_v11 = vperm.slane %v1175_v9, %v2397_v7  ;;  %v561_v36 = vperm.slane %v555_v49, %v2368_v52 }
  0xbf   :  { %v1198_v17 = vrot.slane %v2405_v11, 4 }
  0xc1   :  { %v2416_v22 = vsel %vm542_vm0, %v1198_v17, %v2410_v15  ;;  %v590_v17 = vrot.slane %v561_v36, 4 }
  0xc2   :  { %3820 = vst [vmem:[#allocation17_spill] sm:$0xff] %v2416_v22 }
  0xc4   :  { %286 = vperm.xlu2 %2216, %v281_v21   ;;  %2215 = vset.pattern.permute.xlu1 %v2263_v2 }
  0xc6   :  { %v118_v25 = vpop.permute.xlu1 %117 }
  0xc7   :  { %v578_v43 = vrot.slane %v118_v25, 4  ;;  %v581_v41 = vsel %vm542_vm0, %v118_v25, %v580_v32 }
  0xc8   :  { %v27_v45 = vpop.permute.xlu0 %26 }
  0xc9   :  { %v543_v46 = vsel %vm542_vm0, %v541_v26, %v27_v45  ;;  %v544_v47 = vrot.slane %v27_v45, 4  ;;  %v579_v55 = vsel %vm542_vm0, %v578_v43, %v2347_v38  ;;  %v589_v38 = vperm.slane %v581_v41, %v2368_v52  ;;  %v2455_v45 = vpop.permute.xlu2 %156 }
  0xca   :  { %v549_v54 = vperm.slane %v543_v46, %v2368_v52  ;;  %v585_v63 = vperm.slane %v579_v55, %v2368_v52  ;;  %v307_v41 = vperm.slane %v2280_v10, 6  ;;  %v654_v20 = vrot.slane %v2455_v45, 4 }
  0xcb   :  { %v545_v59 = vsel %vm542_vm0, %v2322_v27, %v544_v47  ;;  %v626_v24 = vrot.slane %v589_v38, 4 }
  0xcc   :  { %v553_v60 = vperm.slane %v545_v59, %v2368_v52  ;;  %v592_v61 = vrot.slane %v549_v54, 4  ;;  %299 = vperm.xlu2 %2216, %v294_v13   ;;  %279 = vperm.xlu1 %2215, %v268_v34   ;;  %v614_v34 = vrot.slane %v585_v63, 4  ;;  %v591_v26 = vsel %vm542_vm0, %v590_v17, %v549_v54 }
  0xcd   :  { %v333_v17 = vperm.slane %v2293_v14, 0 }
  0xce   :  { %v604_v6 = vrot.slane %v553_v60, 4  ;;  %v593_v8 = vsel %vm542_vm0, %v561_v36, %v592_v61  ;;  %v603_v9 = vsel %vm542_vm0, %v602_v62, %v553_v60  ;;  %v2468_v61 = vperm.slane %v591_v26, %v2397_v7 }
  0xcf   :  { %v2452_v32 = vperm.slane %v593_v8, %v2397_v7  ;;  %v609_v43 = vperm.slane %v603_v9, %v2397_v7  ;;  %338 = vperm.xlu0 %2229, %v333_v17  }
  0xd0   :  { %v79_v27 = vpop.permute.xlu0 %78  ;;  %v605_v54 = vsel %vm542_vm0, %v565_v51, %v604_v6 }
  0xd1   :  { %v567_v13 = vsel %vm542_vm0, %v566_v0, %v79_v27  ;;  %v568_v23 = vrot.slane %v79_v27, 4  ;;  %v613_v51 = vperm.slane %v605_v54, %v2397_v7  ;;  %v644_v62 = vrot.slane %v2452_v32, 4 }
  0xd2   :  { %v573_v25 = vperm.slane %v567_v13, %v2368_v52  ;;  %v648_v6 = vrot.slane %v609_v43, 4 }
  0xd3   :  { %v569_v28 = vsel %vm542_vm0, %v2354_v42, %v568_v23 }
  0xd4   :  { %v577_v46 = vperm.slane %v569_v28, %v2368_v52  ;;  %v616_v47 = vrot.slane %v573_v25, 4  ;;  %2218 = vset.pattern.permute.xlu2 %v2263_v2  ;;  %292 = vperm.xlu1 %2215, %v281_v21   ;;  %v615_v49 = vsel %vm542_vm0, %v614_v34, %v573_v25  ;;  %v652_v34 = vrot.slane %v613_v51, 4  ;;  %v170_v25 = vpop.permute.xlu2 %169 }
  0xd5   :  { %v2462_v55 = vperm.slane %v615_v49, %v2397_v7 }
  0xd6   :  { %v628_v42 = vrot.slane %v577_v46, 4  ;;  %v617_v59 = vsel %vm542_vm0, %v585_v63, %v616_v47  ;;  %v627_v60 = vsel %vm542_vm0, %v626_v24, %v577_v46  ;;  %v131_v24 = vpop.permute.xlu1 %130  ;;  %v320_v46 = vperm.slane %v2280_v10, 7 }
  0xd7   :  { %v638_v36 = vrot.slane %v2462_v55, 4  ;;  %v2472_v21 = vperm.slane %v617_v59, %v2397_v7  ;;  %v633_v0 = vperm.slane %v627_v60, %v2397_v7  ;;  %v346_v60 = vperm.slane %v2293_v14, 1 }
  0xd8   :  { %v629_v27 = vsel %vm542_vm0, %v589_v38, %v628_v42  ;;  %v656_v10 = vrot.slane %v131_v24, 4 }
  0xd9   :  { %v2480_v63 = vsel %vm542_vm0, %v638_v36, %v2468_v61  ;;  %v2484_v8 = vsel %vm542_vm0, %v2472_v21, %v644_v62  ;;  %v2487_v9 = vsel %vm542_vm0, %v633_v0, %v648_v6  ;;  %v646_v13 = vrot.slane %v633_v0, 4 }
  0xda   :  { %v637_v23 = vperm.slane %v629_v27, %v2397_v7 }
  0xdb   :  { %v2493_v38 = vsel %vm542_vm0, %v646_v13, %v609_v43  ;;  %v144_v43 = vpop.permute.xlu0 %143 }
  0xdc   :  { %318 = vperm.xlu2 %2218, %v307_v41   ;;  %2217 = vset.pattern.permute.xlu1 %v2258_v1  ;;  %v2496_v26 = vsel %vm542_vm0, %v637_v23, %v652_v34  ;;  %v650_v28 = vrot.slane %v637_v23, 4  ;;  %v2504_v54 = vpop.permute.xlu2 %188  ;;  %v668_v36 = vrot.slane %v144_v43, 4 }
  0xdd   :  { %3823 = vst [vmem:[#allocation20_spill] sm:$0xff] %v2504_v54 }
  0xde   :  { %v2500_v47 = vsel %vm542_vm0, %v650_v28, %v613_v51  ;;  %v2502_v49 = vpop.permute.xlu1 %149  ;;  %v666_v51 = vrot.slane %v170_v25, 4  ;;  %v669_v62 = vsel %vm542_vm0, %v170_v25, %v668_v36  ;;  %v3763_v28 = vperm.slane %v2293_v14, 5 }
  0xdf   :  { %3822 = vst [vmem:[#allocation19_spill] sm:$0xff] %v2502_v49  ;;  %v677_v13 = vperm.slane %v669_v62, %v2368_v52 }
  0xe0   :  { %403 = vperm.xlu0 %2229, %v3763_v28  }
  0xe1   :  { %v714_v62 = vrot.slane %v677_v13, 4 }
  0xe3   :  { %v209_v23 = vpop.permute.xlu0 %208 }
  0xe4   :  { %331 = vperm.xlu2 %2218, %v320_v46   ;;  %312 = vperm.xlu1 %2217, %v307_v41   ;;  %v2509_v59 = vpop.permute.xlu2 %201  ;;  %v657_v41 = vsel %vm542_vm0, %v2455_v45, %v656_v10  ;;  %v678_v10 = vrot.slane %v209_v23, 4 }
  0xe5   :  { %3825 = vst [vmem:[#allocation22_spill] sm:$0xff] %v2509_v59  ;;  %v665_v27 = vperm.slane %v657_v41, %v2368_v52 }
  0xe6   :  { %v2507_v42 = vpop.permute.xlu1 %162 }
  0xe7   :  { %3824 = vst [vmem:[#allocation21_spill] sm:$0xff] %v2507_v42  ;;  %v716_v18 = vrot.slane %v665_v27, 4 }
  0xe9   :  { %v717_v28 = vsel %vm542_vm0, %v677_v13, %v716_v18 }
  0xec   :  { %2220 = vset.pattern.permute.xlu2 %v2258_v1  ;;  %325 = vperm.xlu1 %2217, %v320_v46   ;;  %v667_v46 = vsel %vm542_vm0, %v666_v51, %v144_v43  ;;  %v655_v43 = vsel %vm542_vm0, %v654_v20, %v131_v24  ;;  %v725_v24 = vperm.slane %v717_v28, %v2397_v7 }
  0xed   :  { %v2525_v41 = vperm.slane %v667_v46, %v2368_v52 }
  0xee   :  { %v222_v34 = vpop.permute.xlu2 %221 }
  0xef   :  { %v690_v36 = vrot.slane %v222_v34, 4  ;;  %v702_v46 = vrot.slane %v2525_v41, 4 }
  0xf4   :  { %351 = vperm.xlu2 %2220, %v346_v60   ;;  %2219 = vset.pattern.permute.xlu1 %v2263_v2 }
  0xf6   :  { %v183_v0 = vpop.permute.xlu1 %182 }
  0xf7   :  { %v680_v6 = vrot.slane %v183_v0, 4  ;;  %v679_v22 = vsel %vm542_vm0, %v678_v10, %v183_v0 }
  0xf8   :  { %v2545_v18 = vperm.slane %v679_v22, %v2368_v52 }
  0xf9   :  { %v681_v25 = vsel %vm542_vm0, %v209_v23, %v680_v6 }
  0xfa   :  { %v689_v45 = vperm.slane %v681_v25, %v2368_v52 }
  0xfc   :  { %364 = vperm.xlu2 %2220, %v359_v16   ;;  %344 = vperm.xlu1 %2219, %v333_v17   ;;  %v715_v16 = vsel %vm542_vm0, %v714_v62, %v665_v27  ;;  %v2540_v17 = vperm.slane %v655_v43, %v2368_v52  ;;  %v740_v0 = vrot.slane %v689_v45, 4  ;;  %v2551_v27 = vpop.permute.xlu2 %234 }
  0xfd   :  { %v721_v25 = vperm.slane %v715_v16, %v2397_v7 }
  0xfe   :  { %v196_v51 = vpop.permute.xlu1 %195 }
  0xff   :  { %v691_v6 = vsel %vm542_vm0, %v690_v36, %v196_v51  ;;  %v692_v23 = vrot.slane %v196_v51, 4  ;;  %v760_v16 = vrot.slane %v721_v25, 4 }
 0x100   :  { %v2536_v56 = vperm.slane %v691_v6, %v2368_v52  ;;  %v764_v6 = vrot.slane %v725_v24, 4 }
 0x101   :  { %v693_v20 = vsel %vm542_vm0, %v222_v34, %v692_v23  ;;  %v703_v34 = vsel %vm542_vm0, %v702_v46, %v2540_v17  ;;  %v372_v46 = vperm.slane %v2293_v14, 3 }
 0x102   :  { %v701_v13 = vperm.slane %v693_v20, %v2368_v52  ;;  %v726_v10 = vrot.slane %v2536_v56, 4 }
 0x104   :  { %v738_v36 = vrot.slane %v701_v13, 4  ;;  %2222 = vset.pattern.permute.xlu2 %v2263_v2  ;;  %357 = vperm.xlu1 %2219, %v346_v60   ;;  %v727_v22 = vsel %vm542_vm0, %v726_v10, %v2545_v18  ;;  %v741_v28 = vsel %vm542_vm0, %v701_v13, %v740_v0  ;;  %v2564_v60 = vperm.slane %v703_v34, %v2397_v7 }
 0x105   :  { %v2559_v62 = vperm.slane %v727_v22, %v2397_v7  ;;  %v749_v51 = vperm.slane %v741_v28, %v2397_v7 }
 0x106   :  { %v739_v43 = vsel %vm542_vm0, %v738_v36, %v689_v45 }
 0x107   :  { %v750_v23 = vrot.slane %v2559_v62, 4  ;;  %v745_v20 = vperm.slane %v739_v43, %v2397_v7  ;;  %v762_v10 = vrot.slane %v749_v51, 4  ;;  %v2570_v0 = vsel %vm542_vm0, %v749_v51, %v764_v6  ;;  %v2588_v43 = vpop.permute.xlu2 %253 }
 0x108   :  { %3826 = vst [vmem:[#allocation23_spill] sm:$0xff] %v2570_v0  ;;  %v385_v51 = vperm.slane %v2293_v14, 4  ;;  %v3765_v6 = vperm.slane %v2305_v19, 2 }
 0x109   :  { %v2574_v45 = vsel %vm542_vm0, %v750_v23, %v2564_v60  ;;  %v758_v13 = vrot.slane %v745_v20, 4  ;;  %v2577_v36 = vsel %vm542_vm0, %v762_v10, %v725_v24  ;;  %v2580_v34 = vsel %vm542_vm0, %v745_v20, %v760_v16  ;;  %3829 = vst [vmem:[#allocation26_spill] sm:$0xff] %v2588_v43 }
 0x10a   :  { %3827 = vst [vmem:[#allocation24_spill] sm:$0xff] %v2574_v45  ;;  %v1226_v24 = vrot.slane %v2333_v33, 4  ;;  %468 = vperm.xlu0 %2229, %v3765_v6   ;;  %v1214_v23 = vrot.slane %v2507_v42, 4  ;;  %v3770_v45 = vperm.slane %v2305_v19, 7 }
 0x10b   :  { %v2584_v22 = vsel %vm542_vm0, %v758_v13, %v721_v25 }
 0x10c   :  { %383 = vperm.xlu2 %2222, %v372_v46   ;;  %2221 = vset.pattern.permute.xlu1 %v2258_v1  ;;  %v1227_v25 = vsel %vm542_vm0, %v1226_v24, %v2502_v49  ;;  %v1215_v10 = vsel %vm542_vm0, %v1214_v23, %v2427_v53 }
 0x10d   :  { %v2606_v6 = vperm.slane %v1227_v25, %v2368_v52 }
 0x10e   :  { %v2586_v28 = vpop.permute.xlu1 %214 }
 0x10f   :  { %3828 = vst [vmem:[#allocation25_spill] sm:$0xff] %v2586_v28  ;;  %v1238_v16 = vrot.slane %v2586_v28, 4  ;;  %v2608_v42 = vpop.permute.xlu2 %266  ;;  %v2615_v28 = vperm.slane %v1215_v10, %v2368_v52  ;;  %v1262_v25 = vrot.slane %v2606_v6, 4 }
 0x110   :  { %3831 = vst [vmem:[#allocation28_spill] sm:$0xff] %v2606_v6  ;;  %v1326_v30 = vrot.slane %v2608_v42, 4 }
 0x111   :  { %3832 = vst [vmem:[#allocation29_spill] sm:$0xff] %v2608_v42 }
 0x112   :  { %3833 = vst [vmem:[#allocation30_spill] sm:$0xff] %v2615_v28  ;;  %533 = vperm.xlu0 %2229, %v3770_v45  }
 0x114   :  { %396 = vperm.xlu2 %2222, %v385_v51   ;;  %377 = vperm.xlu1 %2221, %v372_v46   ;;  %v1239_v46 = vsel %vm542_vm0, %v1238_v16, %v2504_v54  ;;  %v1263_v16 = vsel %vm542_vm0, %v1262_v25, %v2615_v28  ;;  %v2650_v25 = vpop.permute.xlu0 %273 }
 0x115   :  { %v2624_v33 = vperm.slane %v1239_v46, %v2368_v52  ;;  %v2637_v45 = vperm.slane %v1263_v16, %v2397_v7  ;;  %v3838_v16 = vperm.slane %v2293_v14, 7 }
 0x116   :  { %v2599_v20 = vpop.permute.xlu1 %227 }
 0x117   :  { %3830 = vst [vmem:[#allocation27_spill] sm:$0xff] %v2599_v20  ;;  %v1250_v13 = vrot.slane %v2599_v20, 4 }
 0x118   :  { %3836 = vst [vmem:[#allocation33_spill] sm:$0xff] %v2637_v45 }
 0x119   :  { %v1251_v24 = vsel %vm542_vm0, %v1250_v13, %v2509_v59  ;;  %v778_v59 = vrot.slane %v2650_v25, 4 }
 0x11a   :  { %v2618_v23 = vperm.slane %v1251_v24, %v2368_v52  ;;  %v411_v24 = vperm.slane %v2293_v14, 6  ;;  %2233 = vset.pattern.permute.xlu0 %v2263_v2 }
 0x11c   :  { %3834 = vst [vmem:[#allocation31_spill] sm:$0xff] %v2618_v23  ;;  %v1286_v53 = vrot.slane %v2618_v23, 4  ;;  %2224 = vset.pattern.permute.xlu2 %v2258_v1  ;;  %390 = vperm.xlu1 %2221, %v385_v51  }
 0x11e   :  { %v1287_v10 = vsel %vm542_vm0, %v1286_v53, %v2624_v33  ;;  %v2640_v54 = vpop.permute.xlu2 %286 }
 0x11f   :  { %v2633_v13 = vperm.slane %v1287_v10, %v2397_v7  ;;  %v3839_v10 = vperm.slane %v2293_v14, 5 }
 0x121   :  { %3835 = vst [vmem:[#allocation32_spill] sm:$0xff] %v2633_v13  ;;  %v1310_v46 = vrot.slane %v2633_v13, 4 }
 0x123   :  { %v2645_v51 = vsel %vm542_vm0, %v1310_v46, %v2637_v45 }
 0x124   :  { %3837 = vst [vmem:[#allocation34_spill] sm:$0xff] %v2645_v51  ;;  %416 = vperm.xlu2 %2224, %v411_v24   ;;  %2223 = vset.pattern.permute.xlu1 %v2263_v2 }
 0x126   :  { %v2648_v53 = vpop.permute.xlu1 %247  ;;  %v2656_v20 = vpop.permute.xlu2 %299 }
 0x127   :  { %v779_v51 = vsel %vm542_vm0, %v778_v59, %v2648_v53  ;;  %v437_v59 = vperm.slane %v2305_v19, 0 }
 0x128   :  { %v2670_v14 = vperm.slane %v779_v51, %v2368_v52 }
 0x12c   :  { %429 = vperm.xlu2 %2224, %v3838_v16   ;;  %409 = vperm.xlu1 %2223, %v3839_v10  }
 0x12e   :  { %v2659_v49 = vpop.permute.xlu1 %260 }
 0x12f   :  { %v766_v46 = vrot.slane %v2659_v49, 4 }
 0x131   :  { %v767_v4 = vsel %vm542_vm0, %v766_v46, %v2551_v27 }
 0x132   :  { %v2667_v31 = vperm.slane %v767_v4, %v2368_v52 }
 0x134   :  { %v816_v16 = vrot.slane %v2667_v31, 4  ;;  %2226 = vset.pattern.permute.xlu2 %v2263_v2  ;;  %422 = vperm.xlu1 %2223, %v411_v24   ;;  %v450_v24 = vperm.slane %v2305_v19, 1 }
 0x136   :  { %v2674_v10 = vpop.permute.xlu2 %318  ;;  %v817_v3 = vsel %vm542_vm0, %v2670_v14, %v816_v16 }
 0x137   :  { %3840 = vst [vmem:[#allocation35_spill] sm:$0xff] %v2674_v10  ;;  %v1350_v48 = vrot.slane %v2674_v10, 4 }
 0x13c   :  { %448 = vperm.xlu2 %2226, %v437_v59   ;;  %2225 = vset.pattern.permute.xlu1 %v2258_v1 }
 0x13e   :  { %v2680_v4 = vpop.permute.xlu1 %279  ;;  %v2682_v46 = vpop.permute.xlu2 %331 }
 0x13f   :  { %3841 = vst [vmem:[#allocation36_spill] sm:$0xff] %v2680_v4  ;;  %v1338_v51 = vrot.slane %v2680_v4, 4  ;;  %v1362_v5 = vrot.slane %v2682_v46, 4  ;;  %v1327_v4 = vsel %vm542_vm0, %v1326_v30, %v2343_v37 }
 0x140   :  { %3842 = vst [vmem:[#allocation37_spill] sm:$0xff] %v2682_v46  ;;  %v3852_v46 = vperm.slane %v2305_v19, 2 }
 0x141   :  { %v1339_v29 = vsel %vm542_vm0, %v1338_v51, %v2588_v43  ;;  %v1363_v16 = vsel %vm542_vm0, %v1362_v5, %v2351_v40  ;;  %v2746_v40 = vpop.permute.xlu0 %338 }
 0x142   :  { %v2693_v35 = vperm.slane %v1363_v16, %v2368_v52  ;;  %v2697_v39 = vperm.slane %v1339_v29, %v2368_v52  ;;  %v2711_v29 = vperm.slane %v1327_v4, %v2368_v52  ;;  %v476_v4 = vperm.slane %v2305_v19, 3 }
 0x144   :  { %3843 = vst [vmem:[#allocation38_spill] sm:$0xff] %v2693_v35  ;;  %461 = vperm.xlu2 %2226, %v450_v24   ;;  %442 = vperm.xlu1 %2225, %v437_v59   ;;  %v1398_v51 = vrot.slane %v2693_v35, 4  ;;  %v1374_v5 = vrot.slane %v2697_v39, 4 }
 0x145   :  { %3844 = vst [vmem:[#allocation39_spill] sm:$0xff] %v2697_v39  ;;  %v814_v39 = vrot.slane %v2670_v14, 4 }
 0x146   :  { %v2702_v43 = vpop.permute.xlu1 %292  ;;  %3847 = vst [vmem:[#allocation42_spill] sm:$0xff] %v2711_v29  ;;  %v1375_v30 = vsel %vm542_vm0, %v1374_v5, %v2711_v29 }
 0x147   :  { %3845 = vst [vmem:[#allocation40_spill] sm:$0xff] %v2702_v43  ;;  %v1351_v16 = vsel %vm542_vm0, %v1350_v48, %v2702_v43 }
 0x148   :  { %v2708_v42 = vperm.slane %v1351_v16, %v2368_v52  ;;  %v2723_v16 = vperm.slane %v1375_v30, %v2397_v7  ;;  %v3851_v30 = vperm.slane %v2305_v19, 4 }
 0x14a   :  { %3846 = vst [vmem:[#allocation41_spill] sm:$0xff] %v2708_v42  ;;  %v1399_v59 = vsel %vm542_vm0, %v1398_v51, %v2708_v42 }
 0x14b   :  { %v2718_v37 = vperm.slane %v1399_v59, %v2397_v7  ;;  %3849 = vst [vmem:[#allocation44_spill] sm:$0xff] %v2723_v16 }
 0x14c   :  { %2228 = vset.pattern.permute.xlu2 %v2258_v1  ;;  %455 = vperm.xlu1 %2225, %v450_v24  }
 0x14d   :  { %3848 = vst [vmem:[#allocation43_spill] sm:$0xff] %v2718_v37  ;;  %v1422_v48 = vrot.slane %v2718_v37, 4 }
 0x14e   :  { %v2733_v5 = vpop.permute.xlu2 %351 }
 0x14f   :  { %v2728_v10 = vsel %vm542_vm0, %v1422_v48, %v2723_v16  ;;  %v880_v16 = vrot.slane %v2746_v40, 4 }
 0x150   :  { %3850 = vst [vmem:[#allocation45_spill] sm:$0xff] %v2728_v10 }
 0x154   :  { %481 = vperm.xlu2 %2228, %v476_v4   ;;  %2227 = vset.pattern.permute.xlu1 %v2263_v2 }
 0x156   :  { %v2731_v51 = vpop.permute.xlu1 %312  ;;  %v2748_v37 = vpop.permute.xlu2 %364 }
 0x157   :  { %v790_v24 = vrot.slane %v2731_v51, 4 }
 0x159   :  { %v791_v59 = vsel %vm542_vm0, %v790_v24, %v2640_v54 }
 0x15a   :  { %v797_v48 = vperm.slane %v791_v59, %v2368_v52  ;;  %v825_v59 = vperm.slane %v817_v3, %v2397_v7  ;;  %v502_v3 = vperm.slane %v2305_v19, 5 }
 0x15c   :  { %494 = vperm.xlu2 %2228, %v3851_v30   ;;  %474 = vperm.xlu1 %2227, %v3852_v46   ;;  %v840_v35 = vrot.slane %v797_v48, 4  ;;  %v881_v46 = vsel %vm542_vm0, %v2748_v37, %v880_v16  ;;  %v868_v50 = vrot.slane %v825_v59, 4 }
 0x15e   :  { %v2743_v10 = vpop.permute.xlu1 %325 }
 0x15f   :  { %v802_v43 = vrot.slane %v2743_v10, 4 }
 0x161   :  { %v803_v24 = vsel %vm542_vm0, %v802_v43, %v2656_v20  ;;  %v815_v43 = vsel %vm542_vm0, %v814_v39, %v2667_v31 }
 0x162   :  { %v809_v30 = vperm.slane %v803_v24, %v2368_v52 }
 0x164   :  { %v838_v42 = vrot.slane %v809_v30, 4  ;;  %2231 = vset.pattern.permute.xlu2 %v2263_v2  ;;  %487 = vperm.xlu1 %2227, %v476_v4   ;;  %v841_v29 = vsel %vm542_vm0, %v809_v30, %v840_v35  ;;  %v821_v4 = vperm.slane %v815_v43, %v2397_v7 }
 0x165   :  { %v849_v13 = vperm.slane %v841_v29, %v2397_v7 }
 0x166   :  { %v839_v24 = vsel %vm542_vm0, %v838_v42, %v797_v48  ;;  %v384_v29 = vpop.permute.xlu2 %383  ;;  %v1438_v42 = vrot.slane %v2357_v44, 4 }
 0x167   :  { %v845_v16 = vperm.slane %v839_v24, %v2397_v7  ;;  %v866_v45 = vrot.slane %v849_v13, 4  ;;  %v2767_v14 = vsel %vm542_vm0, %v849_v13, %v868_v50  ;;  %v515_v50 = vperm.slane %v2305_v19, 6 }
 0x169   :  { %v862_v0 = vrot.slane %v845_v16, 4  ;;  %v2771_v35 = vsel %vm542_vm0, %v866_v45, %v825_v59  ;;  %v1450_v45 = vrot.slane %v384_v29, 4 }
 0x16b   :  { %v2774_v31 = vsel %vm542_vm0, %v862_v0, %v821_v4 }
 0x16c   :  { %513 = vperm.xlu2 %2231, %v502_v3   ;;  %2230 = vset.pattern.permute.xlu1 %v2258_v1 }
 0x16e   :  { %v345_v39 = vpop.permute.xlu1 %344  ;;  %v2783_v0 = vpop.permute.xlu2 %396 }
 0x16f   :  { %v1440_v48 = vrot.slane %v345_v39, 4  ;;  %v1439_v13 = vsel %vm542_vm0, %v1438_v42, %v345_v39 }
 0x170   :  { %v1445_v59 = vperm.slane %v1439_v13, %v2368_v52 }
 0x171   :  { %v1441_v30 = vsel %vm542_vm0, %v2357_v44, %v1440_v48  ;;  %v640_v44 = vrot.slane %v2468_v61, 4  ;;  %v878_v61 = vrot.slane %v2748_v37, 4 }
 0x172   :  { %v1449_v1 = vperm.slane %v1441_v30, %v2368_v52  ;;  %v1488_v6 = vrot.slane %v1445_v59, 4 }
 0x173   :  { %v641_v30 = vsel %vm542_vm0, %v2462_v55, %v640_v44  ;;  %v879_v55 = vsel %vm542_vm0, %v878_v61, %v2746_v40 }
 0x174   :  { %526 = vperm.xlu2 %2231, %v515_v50   ;;  %507 = vperm.xlu1 %2230, %v502_v3   ;;  %v1500_v42 = vrot.slane %v1449_v1, 4  ;;  %v885_v37 = vperm.slane %v879_v55, %v2368_v52 }
 0x176   :  { %v358_v43 = vpop.permute.xlu1 %357 }
 0x177   :  { %v1451_v24 = vsel %vm542_vm0, %v1450_v45, %v358_v43  ;;  %v1452_v58 = vrot.slane %v358_v43, 4  ;;  %v864_v43 = vrot.slane %v821_v4, 4  ;;  %v642_v4 = vrot.slane %v2472_v21, 4 }
 0x178   :  { %v1457_v28 = vperm.slane %v1451_v24, %v2368_v52  ;;  %v892_v24 = vrot.slane %v2733_v5, 4 }
 0x179   :  { %v1453_v39 = vsel %vm542_vm0, %v384_v29, %v1452_v58 }
 0x17a   :  { %v1461_v48 = vperm.slane %v1453_v39, %v2368_v52  ;;  %v1486_v13 = vrot.slane %v1457_v28, 4  ;;  %v2792_v3 = vsel %vm542_vm0, %v1457_v28, %v1488_v6  ;;  %v404_v6 = vpop.permute.xlu0 %403 }
 0x17b   :  { %v916_v39 = vrot.slane %v404_v6, 4 }
 0x17c   :  { %v1498_v23 = vrot.slane %v1461_v48, 4  ;;  %520 = vperm.xlu1 %2230, %v515_v50   ;;  %1667 = vrot.lane.b32.xlu2 %v641_v30, %s2236_s0  ;;  %v2798_v45 = vsel %vm542_vm0, %v1486_v13, %v1445_v59  ;;  %v2801_v58 = vsel %vm542_vm0, %v1461_v48, %v1500_v42  ;;  %v889_v50 = vperm.slane %v881_v46, %v2368_v52 }
 0x17d   :  { %v865_v59 = vsel %vm542_vm0, %v845_v16, %v864_v43  ;;  %v928_v13 = vrot.slane %v885_v37, 4 }
 0x17e   :  { %v417_v29 = vpop.permute.xlu2 %416  ;;  %v2805_v28 = vsel %vm542_vm0, %v1498_v23, %v1449_v1  ;;  %v940_v23 = vrot.slane %v889_v50, 4 }
 0x17f   :  { %v902_v21 = vrot.slane %v417_v29, 4 }
 0x184   :  { %2232 = vset.pattern.permute.xlu1 %v2263_v2  ;;  %1671 = vrot.lane.b32.xlu2 %v865_v59, %s2236_s0 }
 0x186   :  { %v378_v1 = vpop.permute.xlu1 %377  ;;  %v430_v44 = vpop.permute.xlu2 %429 }
 0x187   :  { %v890_v42 = vrot.slane %v378_v1, 4  ;;  %v893_v40 = vsel %vm542_vm0, %v378_v1, %v892_v24  ;;  %v914_v46 = vrot.slane %v430_v44, 4  ;;  %v917_v48 = vsel %vm542_vm0, %v430_v44, %v916_v39 }
 0x188   :  { %v901_v16 = vperm.slane %v893_v40, %v2368_v52  ;;  %v643_v24 = vsel %vm542_vm0, %v642_v4, %v2452_v32  ;;  %v728_v39 = vrot.slane %v2545_v18, 4  ;;  %v3853_v44 = vperm.slane %v2305_v19, 7 }
 0x189   :  { %v891_v2 = vsel %vm542_vm0, %v890_v42, %v2733_v5  ;;  %v915_v30 = vsel %vm542_vm0, %v914_v46, %v404_v6  ;;  %v925_v5 = vperm.slane %v917_v48, %v2368_v52 }
 0x18a   :  { %v897_v61 = vperm.slane %v891_v2, %v2368_v52  ;;  %v938_v43 = vrot.slane %v901_v16, 4  ;;  %v921_v55 = vperm.slane %v915_v30, %v2368_v52  ;;  %v941_v59 = vsel %vm542_vm0, %v901_v16, %v940_v23 }
 0x18b   :  { %v729_v32 = vsel %vm542_vm0, %v2536_v56, %v728_v39  ;;  %v962_v16 = vrot.slane %v925_v5, 4  ;;  %v752_v56 = vrot.slane %v2564_v60, 4 }
 0x18c   :  { %v926_v1 = vrot.slane %v897_v61, 4  ;;  %539 = vperm.xlu1 %2232, %v3853_v44   ;;  %1687 = vrot.lane.b32.xlu2 %v643_v24, %s2237_s19  ;;  %v939_v6 = vsel %vm542_vm0, %v938_v43, %v889_v50  ;;  %v929_v42 = vsel %vm542_vm0, %v897_v61, %v928_v13  ;;  %v950_v4 = vrot.slane %v921_v55, 4 }
 0x18d   :  { %v937_v48 = vperm.slane %v929_v42, %v2397_v7  ;;  %v704_v50 = vrot.slane %v2540_v17, 4  ;;  %v737_v30 = vperm.slane %v729_v32, %v2397_v7  ;;  %v753_v24 = vsel %vm542_vm0, %v2559_v62, %v752_v56 }
 0x18e   :  { %v391_v23 = vpop.permute.xlu1 %390  ;;  %v927_v18 = vsel %vm542_vm0, %v926_v1, %v885_v37  ;;  %v949_v17 = vperm.slane %v941_v59, %v2397_v7 }
 0x18f   :  { %v903_v40 = vsel %vm542_vm0, %v902_v21, %v391_v23  ;;  %v904_v19 = vrot.slane %v391_v23, 4  ;;  %v933_v46 = vperm.slane %v927_v18, %v2397_v7  ;;  %v945_v21 = vperm.slane %v939_v6, %v2397_v7 }
 0x190   :  { %v909_v2 = vperm.slane %v903_v40, %v2368_v52  ;;  %v980_v44 = vrot.slane %v937_v48, 4  ;;  %v705_v40 = vsel %vm542_vm0, %v2525_v41, %v704_v50  ;;  %v988_v56 = vrot.slane %v949_v17, 4 }
 0x191   :  { %v905_v13 = vsel %vm542_vm0, %v417_v29, %v904_v19  ;;  %v976_v1 = vrot.slane %v933_v46, 4  ;;  %v984_v23 = vrot.slane %v945_v21, 4 }
 0x192   :  { %v913_v37 = vperm.slane %v905_v13, %v2368_v52  ;;  %v952_v61 = vrot.slane %v909_v2, 4  ;;  %v951_v43 = vsel %vm542_vm0, %v950_v4, %v909_v2 }
 0x193   :  { %v957_v39 = vperm.slane %v951_v43, %v2397_v7 }
 0x194   :  { %v964_v29 = vrot.slane %v913_v37, 4  ;;  %1669 = vrot.lane.b32.xlu1 %v753_v24, %s2236_s0  ;;  %v953_v60 = vsel %vm542_vm0, %v921_v55, %v952_v61  ;;  %v963_v42 = vsel %vm542_vm0, %v962_v16, %v913_v37  ;;  %v713_v61 = vperm.slane %v705_v40, %v2397_v7 }
 0x195   :  { %v977_v32 = vsel %vm542_vm0, %v957_v39, %v976_v1  ;;  %v974_v4 = vrot.slane %v957_v39, 4  ;;  %v961_v6 = vperm.slane %v953_v60, %v2397_v7  ;;  %v969_v62 = vperm.slane %v963_v42, %v2397_v7 }
 0x196   :  { %1673 = vrot.lane.b32.xlu0 %v977_v32, %s2236_s0  ;;  %v965_v59 = vsel %vm542_vm0, %v925_v5, %v964_v29  ;;  %v754_v5 = vrot.slane %v737_v30, 4  ;;  %v756_v29 = vrot.slane %v713_v61, 4  ;;  %v1464_v32 = vrot.slane %v2783_v0, 4 }
 0x197   :  { %v978_v18 = vrot.slane %v961_v6, 4  ;;  %v2863_v55 = vsel %vm542_vm0, %v974_v4, %v933_v46  ;;  %v2866_v19 = vsel %vm542_vm0, %v961_v6, %v980_v44  ;;  %v2869_v16 = vsel %vm542_vm0, %v969_v62, %v984_v23 }
 0x198   :  { %v982_v2 = vrot.slane %v969_v62, 4  ;;  %v973_v13 = vperm.slane %v965_v59, %v2397_v7  ;;  %v755_v24 = vsel %vm542_vm0, %v754_v5, %v713_v61  ;;  %v757_v44 = vsel %vm542_vm0, %v737_v30, %v756_v29 }
 0x199   :  { %v979_v37 = vsel %vm542_vm0, %v978_v18, %v937_v48  ;;  %v2886_v48 = vpop.permute.xlu2 %448  ;;  %v1493_v40 = vperm.slane %v2798_v45, %v2397_v7  ;;  %v1497_v61 = vperm.slane %v2792_v3, %v2397_v7 }
 0x19a   :  { %1693 = vrot.lane.b32.xlu2 %v979_v37, %s2237_s19  ;;  %v2875_v41 = vsel %vm542_vm0, %v982_v2, %v945_v21  ;;  %v986_v46 = vrot.slane %v973_v13, 4  ;;  %v2878_v50 = vsel %vm542_vm0, %v973_v13, %v988_v56  ;;  %v1474_v21 = vrot.slane %v2376_v57, 4 }
 0x19b   :  { %v1509_v13 = vperm.slane %v2801_v58, %v2397_v7 }
 0x19c   :  { %v2882_v43 = vsel %vm542_vm0, %v986_v46, %v949_v17 }
 0x19e   :  { %v410_v39 = vpop.permute.xlu1 %409  ;;  %1689 = vrot.lane.b32.xlu0 %v755_v24, %s2237_s19 }
 0x19f   :  { %v1476_v1 = vrot.slane %v410_v39, 4  ;;  %v1475_v17 = vsel %vm542_vm0, %v1474_v21, %v410_v39 }
 0x1a0   :  { %v1481_v4 = vperm.slane %v1475_v17, %v2368_v52  ;;  %v1548_v17 = vrot.slane %v1509_v13, 4 }
 0x1a1   :  { %v1477_v60 = vsel %vm542_vm0, %v2376_v57, %v1476_v1  ;;  %v1505_v57 = vperm.slane %v2805_v28, %v2397_v7  ;;  %v2901_v18 = vpop.permute.xlu2 %461  ;;  %v1536_v1 = vrot.slane %v1493_v40, 4 }
 0x1a2   :  { %1709 = vrot.lane.b32.xlu2 %v757_v44, %s2238_s20  ;;  %v1485_v42 = vperm.slane %v1477_v60, %v2368_v52  ;;  %v1510_v56 = vrot.slane %v1481_v4, 4 }
 0x1a3   :  { %v1544_v24 = vrot.slane %v1505_v57, 4 }
 0x1a4   :  { %v1522_v59 = vrot.slane %v1485_v42, 4 }
 0x1a6   :  { %v423_v6 = vpop.permute.xlu1 %422 }
 0x1a7   :  { %v1462_v62 = vrot.slane %v423_v6, 4  ;;  %v1465_v23 = vsel %vm542_vm0, %v423_v6, %v1464_v32 }
 0x1a8   :  { %v1473_v30 = vperm.slane %v1465_v23, %v2368_v52 }
 0x1a9   :  { %v1463_v2 = vsel %vm542_vm0, %v1462_v62, %v2783_v0  ;;  %v1540_v62 = vrot.slane %v1497_v61, 4 }
 0x1aa   :  { %v1469_v37 = vperm.slane %v1463_v2, %v2368_v52  ;;  %v1523_v5 = vsel %vm542_vm0, %v1522_v59, %v1473_v30  ;;  %v1524_v28 = vrot.slane %v1473_v30, 4 }
 0x1ab   :  { %v1529_v46 = vperm.slane %v1523_v5, %v2397_v7 }
 0x1ac   :  { %v1512_v39 = vrot.slane %v1469_v37, 4  ;;  %v1511_v45 = vsel %vm542_vm0, %v1510_v56, %v1469_v37  ;;  %v1525_v0 = vsel %vm542_vm0, %v1485_v42, %v1524_v28 }
 0x1ad   :  { %v1517_v58 = vperm.slane %v1511_v45, %v2397_v7  ;;  %v1542_v29 = vrot.slane %v1529_v46, 4  ;;  %v2918_v21 = vsel %vm542_vm0, %v1529_v46, %v1544_v24  ;;  %v1533_v60 = vperm.slane %v1525_v0, %v2397_v7  ;;  %v469_v46 = vpop.permute.xlu0 %468 }
 0x1ae   :  { %v1513_v44 = vsel %vm542_vm0, %v1481_v4, %v1512_v39  ;;  %v482_v56 = vpop.permute.xlu2 %481 }
 0x1af   :  { %v1534_v32 = vrot.slane %v1517_v58, 4  ;;  %v2923_v3 = vsel %vm542_vm0, %v1517_v58, %v1536_v1  ;;  %v1521_v6 = vperm.slane %v1513_v44, %v2397_v7  ;;  %v2927_v42 = vsel %vm542_vm0, %v1542_v29, %v1505_v57 }
 0x1b0   :  { %v2930_v23 = vsel %vm542_vm0, %v1533_v60, %v1548_v17  ;;  %v1546_v59 = vrot.slane %v1533_v60, 4  ;;  %v1552_v17 = vrot.slane %v2886_v48, 4 }
 0x1b1   :  { %3854 = vst [vmem:[#allocation46_spill] sm:$0xff] %v2930_v23  ;;  %v1538_v30 = vrot.slane %v1521_v6, 4  ;;  %v2933_v2 = vsel %vm542_vm0, %v1521_v6, %v1540_v62  ;;  %v2936_v4 = vsel %vm542_vm0, %v1534_v32, %v1493_v40 }
 0x1b2   :  { %3855 = vst [vmem:[#allocation47_spill] sm:$0xff] %v2936_v4  ;;  %v2939_v37 = vsel %vm542_vm0, %v1546_v59, %v1509_v13 }
 0x1b3   :  { %3856 = vst [vmem:[#allocation48_spill] sm:$0xff] %v2939_v37  ;;  %v2942_v5 = vsel %vm542_vm0, %v1538_v30, %v1497_v61 }
 0x1b6   :  { %v443_v57 = vpop.permute.xlu1 %442  ;;  %v2945_v39 = vpop.permute.xlu2 %494 }
 0x1b7   :  { %v992_v28 = vrot.slane %v443_v57, 4 }
 0x1b9   :  { %v993_v24 = vsel %vm542_vm0, %v469_v46, %v992_v28 }
 0x1ba   :  { %v1001_v45 = vperm.slane %v993_v24, %v2368_v52  ;;  %v1564_v24 = vrot.slane %v2901_v18, 4 }
 0x1bc   :  { %v1052_v58 = vrot.slane %v1001_v45, 4 }
 0x1be   :  { %v456_v1 = vpop.permute.xlu1 %455 }
 0x1bf   :  { %v1004_v0 = vrot.slane %v456_v1, 4 }
 0x1c1   :  { %v1005_v40 = vsel %vm542_vm0, %v482_v56, %v1004_v0 }
 0x1c2   :  { %v1013_v13 = vperm.slane %v1005_v40, %v2368_v52 }
 0x1c4   :  { %v1050_v29 = vrot.slane %v1013_v13, 4  ;;  %v2951_v61 = vsel %vm542_vm0, %v1013_v13, %v1052_v58 }
 0x1c6   :  { %v2953_v60 = vpop.permute.xlu2 %513  ;;  %v2956_v44 = vsel %vm542_vm0, %v1050_v29, %v1001_v45 }
 0x1ce   :  { %v2959_v32 = vpop.permute.xlu2 %526  ;;  %v475_v6 = vpop.permute.xlu1 %474 }
 0x1cf   :  { %v1550_v62 = vrot.slane %v475_v6, 4  ;;  %v1553_v59 = vsel %vm542_vm0, %v475_v6, %v1552_v17 }
 0x1d0   :  { %v1561_v28 = vperm.slane %v1553_v59, %v2368_v52 }
 0x1d1   :  { %v1551_v30 = vsel %vm542_vm0, %v1550_v62, %v2886_v48 }
 0x1d2   :  { %v1557_v0 = vperm.slane %v1551_v30, %v2368_v52  ;;  %v1612_v4 = vrot.slane %v1561_v28, 4 }
 0x1d4   :  { %v1600_v6 = vrot.slane %v1557_v0, 4 }
 0x1d6   :  { %v488_v45 = vpop.permute.xlu1 %487  ;;  %v1668_v40 = vpop.permute.xlu2 %1667 }
 0x1d7   :  { %v1562_v58 = vrot.slane %v488_v45, 4  ;;  %v1565_v13 = vsel %vm542_vm0, %v488_v45, %v1564_v24  ;;  %v1943_v29 = vsel %vm1942_vm1, %v2480_v63, %v1668_v40  ;;  %v1002_v40 = vrot.slane %v482_v56, 4 }
 0x1d8   :  { %v1573_v17 = vperm.slane %v1565_v13, %v2368_v52  ;;  %v2991_v13 = vpop.permute.xlu0 %533  ;;  %v804_v56 = vrot.slane %v2656_v20, 4 }
 0x1d9   :  { %v1563_v48 = vsel %vm542_vm0, %v1562_v58, %v2901_v18  ;;  %v1003_v58 = vsel %vm542_vm0, %v1002_v40, %v456_v1 }
 0x1da   :  { %v1569_v62 = vperm.slane %v1563_v48, %v2368_v52  ;;  %v1610_v59 = vrot.slane %v1573_v17, 4  ;;  %v2975_v30 = vsel %vm542_vm0, %v1573_v17, %v1612_v4  ;;  %v990_v4 = vrot.slane %v469_v46, 4 }
 0x1db   :  { %v805_v46 = vsel %vm542_vm0, %v2743_v10, %v804_v56 }
 0x1dc   :  { %v1598_v37 = vrot.slane %v1569_v62, 4  ;;  %v2978_v23 = vsel %vm542_vm0, %v1610_v59, %v1561_v28  ;;  %v2981_v24 = vsel %vm542_vm0, %v1569_v62, %v1600_v6  ;;  %v1009_v28 = vperm.slane %v1003_v58, %v2368_v52 }
 0x1dd   :  { %v991_v6 = vsel %vm542_vm0, %v990_v4, %v443_v57  ;;  %v792_v59 = vrot.slane %v2640_v54, 4  ;;  %v3009_v57 = vperm.slane %v805_v46, %v2368_v52  ;;  %v780_v58 = vrot.slane %v2648_v53, 4 }
 0x1de   :  { %v1672_v63 = vpop.permute.xlu2 %1671  ;;  %v2984_v45 = vsel %vm542_vm0, %v1598_v37, %v1557_v0  ;;  %v997_v1 = vperm.slane %v991_v6, %v2368_v52  ;;  %v1038_v0 = vrot.slane %v1009_v28, 4 }
 0x1df   :  { %v2988_v18 = vsel %vm1942_vm1, %v2774_v31, %v1672_v63  ;;  %v1026_v31 = vrot.slane %v2991_v13, 4  ;;  %v850_v56 = vrot.slane %v3009_v57, 4  ;;  %v781_v53 = vsel %vm542_vm0, %v2650_v25, %v780_v58 }
 0x1e0   :  { %v1039_v40 = vsel %vm542_vm0, %v1038_v0, %v997_v1 }
 0x1e1   :  { %v1045_v6 = vperm.slane %v1039_v40, %v2397_v7 }
 0x1e3   :  { %v1088_v40 = vrot.slane %v1045_v6, 4 }
 0x1e6   :  { %v2994_v17 = vpop.permute.xlu1 %507  ;;  %v1688_v48 = vpop.permute.xlu2 %1687 }
 0x1e7   :  { %v2998_v37 = vsel %vm1948_vm2, %v1943_v29, %v1688_v48  ;;  %v1027_v62 = vsel %vm542_vm0, %v1026_v31, %v2994_v17  ;;  %v1040_v29 = vrot.slane %v997_v1, 4  ;;  %v793_v48 = vsel %vm542_vm0, %v2731_v51, %v792_v59 }
 0x1e8   :  { %v1033_v63 = vperm.slane %v1027_v62, %v2368_v52  ;;  %v768_v1 = vrot.slane %v2551_v27, 4  ;;  %v3030_v0 = vperm.slane %v793_v48, %v2368_v52 }
 0x1e9   :  { %v1041_v10 = vsel %vm542_vm0, %v1009_v28, %v1040_v29 }
 0x1ea   :  { %v1062_v31 = vrot.slane %v1033_v63, 4  ;;  %v1049_v28 = vperm.slane %v1041_v10, %v2397_v7  ;;  %v769_v59 = vsel %vm542_vm0, %v2659_v49, %v768_v1  ;;  %v851_v25 = vsel %vm542_vm0, %v850_v56, %v3030_v0 }
 0x1eb   :  { %v3050_v1 = vperm.slane %v851_v25, %v2397_v7 }
 0x1ee   :  { %v3012_v20 = vpop.permute.xlu1 %520 }
 0x1ef   :  { %v1014_v4 = vrot.slane %v3012_v20, 4 }
 0x1f1   :  { %v1015_v54 = vsel %vm542_vm0, %v1014_v4, %v2945_v39  ;;  %v3037_v4 = vperm.slane %v781_v53, %v2368_v52 }
 0x1f2   :  { %v1021_v46 = vperm.slane %v1015_v54, %v2368_v52  ;;  %v1092_v54 = vrot.slane %v1049_v28, 4 }
 0x1f3   :  { %v826_v56 = vrot.slane %v3037_v4, 4 }
 0x1f4   :  { %v1064_v51 = vrot.slane %v1021_v46, 4  ;;  %v1063_v62 = vsel %vm542_vm0, %v1062_v31, %v1021_v46  ;;  %v3045_v31 = vperm.slane %v769_v59, %v2368_v52  ;;  %v870_v59 = vrot.slane %v3050_v1, 4 }
 0x1f5   :  { %v1069_v29 = vperm.slane %v1063_v62, %v2397_v7  ;;  %v1574_v62 = vrot.slane %v2959_v32, 4 }
 0x1f6   :  { %v1065_v27 = vsel %vm542_vm0, %v1033_v63, %v1064_v51  ;;  %v827_v51 = vsel %vm542_vm0, %v826_v56, %v3045_v31  ;;  %v1016_v56 = vrot.slane %v2945_v39, 4 }
 0x1f7   :  { %v1089_v58 = vsel %vm542_vm0, %v1069_v29, %v1088_v40  ;;  %v1086_v10 = vrot.slane %v1069_v29, 4  ;;  %v1073_v48 = vperm.slane %v1065_v27, %v2397_v7  ;;  %v3067_v40 = vperm.slane %v827_v51, %v2397_v7 }
 0x1f8   :  { %1675 = vrot.lane.b32.xlu1 %v1089_v58, %s2236_s0  ;;  %v1017_v39 = vsel %vm542_vm0, %v3012_v20, %v1016_v56 }
 0x1f9   :  { %v1093_v49 = vsel %vm542_vm0, %v1073_v48, %v1092_v54  ;;  %v1090_v46 = vrot.slane %v1073_v48, 4  ;;  %v3053_v63 = vsel %vm542_vm0, %v1086_v10, %v1045_v6  ;;  %v871_v25 = vsel %vm542_vm0, %v870_v59, %v3067_v40 }
 0x1fa   :  { %1715 = vrot.lane.b32.xlu2 %v1093_v49, %s2238_s20  ;;  %v1028_v54 = vrot.slane %v2994_v17, 4 }
 0x1fb   :  { %v1091_v53 = vsel %vm542_vm0, %v1090_v46, %v1049_v28  ;;  %v1575_v28 = vsel %vm542_vm0, %v1574_v62, %v2407_v12 }
 0x1fc   :  { %1695 = vrot.lane.b32.xlu0 %v1091_v53, %s2237_s19  ;;  %v3082_v10 = vperm.slane %v1575_v28, %v2368_v52  ;;  %v1694_v53 = vpop.permute.xlu2 %1693 }
 0x1fe   :  { %v3063_v29 = vpop.permute.xlu1 %539 }
 0x1ff   :  { %v1586_v6 = vrot.slane %v3063_v29, 4 }
 0x200   :  { %1691 = vrot.lane.b32.xlu1 %v2771_v35, %s2237_s19 }
 0x201   :  { %v1587_v27 = vsel %vm542_vm0, %v1586_v6, %v2953_v60 }
 0x202   :  { %v3078_v58 = vperm.slane %v1587_v27, %v2368_v52  ;;  %1731 = vrot.lane.b32.xlu2 %v871_v25, %s2239_s21 }
 0x204   :  { %v1622_v35 = vrot.slane %v3078_v58, 4  ;;  %1711 = vrot.lane.b32.xlu0 %v2767_v14, %s2238_s20  ;;  %v3100_v14 = vperm.slane %v2984_v45, %v2397_v7 }
 0x206   :  { %v1623_v48 = vsel %vm542_vm0, %v1622_v35, %v3082_v10  ;;  %v1061_v35 = vperm.slane %v2951_v61, %v2397_v7  ;;  %v872_v61 = vrot.slane %v3067_v40, 4  ;;  %v1288_v40 = vrot.slane %v2624_v33, 4  ;;  %v3859_v33 = vld [vmem:[#allocation28_spill] sm:$0xff] }
 0x207   :  { %v3091_v49 = vperm.slane %v1623_v48, %v2397_v7 }
 0x208   :  { %1707 = vrot.lane.b32.xlu1 %v2484_v8, %s2238_s20  ;;  %v1674_v46 = vpop.permute.xlu0 %1673  ;;  %v1029_v8 = vsel %vm542_vm0, %v2991_v13, %v1028_v54 }
 0x209   :  { %v1946_v51 = vsel %vm1942_vm1, %v2863_v55, %v1674_v46  ;;  %v1646_v62 = vrot.slane %v3091_v49, 4  ;;  %v1037_v45 = vperm.slane %v1029_v8, %v2368_v52 }
 0x20a   :  { %1747 = vrot.lane.b32.xlu2 %v2487_v9, %s2240_s22  ;;  %v3106_v17 = vsel %vm1948_vm2, %v1946_v51, %v1694_v53  ;;  %v1025_v9 = vperm.slane %v1017_v39, %v2368_v52  ;;  %v1200_v51 = vrot.slane %v2410_v15, 4  ;;  %v3858_v39 = vld [vmem:[#allocation30_spill] sm:$0xff] }
 0x20b   :  { %v3114_v55 = vsel %vm542_vm0, %v1646_v62, %v3100_v14  ;;  %v1074_v59 = vrot.slane %v1037_v45, 4  ;;  %v3857_v62 = vld [vmem:[#allocation31_spill] sm:$0xff] }
 0x20c   :  { %1727 = vrot.lane.b32.xlu0 %v2493_v38, %s2239_s21  ;;  %v1076_v6 = vrot.slane %v1025_v9, 4  ;;  %v1289_v8 = vsel %vm542_vm0, %v3857_v62, %v1288_v40  ;;  %v3873_v62 = vld [vmem:[#allocation2_spill] sm:$0xff] }
 0x20d   :  { %v1075_v13 = vsel %vm542_vm0, %v1074_v59, %v1025_v9  ;;  %v3180_v15 = vperm.slane %v1289_v8, %v2397_v7  ;;  %v1104_v8 = vrot.slane %v3873_v62, 4 }
 0x20e   :  { %v1077_v20 = vsel %vm542_vm0, %v1037_v45, %v1076_v6  ;;  %v1081_v38 = vperm.slane %v1075_v13, %v2397_v7  ;;  %v1264_v45 = vrot.slane %v3858_v39, 4  ;;  %v3874_v39 = vld [vmem:[#allocation16_spill] sm:$0xff] }
 0x20f   :  { %v3132_v28 = vperm.slane %v1077_v20, %v2397_v7 }
 0x210   :  { %1713 = vrot.lane.b32.xlu1 %v2866_v19, %s2238_s20  ;;  %v1094_v19 = vrot.slane %v1081_v38, 4 }
 0x211   :  { %v1098_v27 = vrot.slane %v3132_v28, 4 }
 0x212   :  { %1753 = vrot.lane.b32.xlu2 %v2869_v16, %s2240_s22  ;;  %v828_v16 = vrot.slane %v3045_v31, 4 }
 0x213   :  { %v1099_v31 = vsel %vm542_vm0, %v1098_v27, %v1061_v35 }
 0x214   :  { %1733 = vrot.lane.b32.xlu0 %v2875_v41, %s2239_s21  ;;  %v1057_v41 = vperm.slane %v2956_v44, %v2397_v7 }
 0x216   :  { %v1095_v25 = vsel %vm542_vm0, %v1094_v19, %v1057_v41  ;;  %v1096_v44 = vrot.slane %v1057_v41, 4  ;;  %v3864_v19 = vld [vmem:[#allocation32_spill] sm:$0xff]  ;;  %v3865_v41 = vld [vmem:[#allocation42_spill] sm:$0xff] }
 0x217   :  { %v1376_v27 = vrot.slane %v3865_v41, 4 }
 0x218   :  { %1729 = vrot.lane.b32.xlu1 %v2584_v22, %s2239_s21  ;;  %v852_v22 = vrot.slane %v3030_v0, 4  ;;  %v1097_v0 = vsel %vm542_vm0, %v1081_v38, %v1096_v44  ;;  %v3863_v38 = vld [vmem:[#allocation11_spill] sm:$0xff] }
 0x21a   :  { %1769 = vrot.lane.b32.xlu2 %v2577_v36, %s2241_s23  ;;  %v829_v36 = vsel %vm542_vm0, %v3037_v4, %v828_v16  ;;  %v873_v4 = vsel %vm542_vm0, %v3050_v1, %v872_v61  ;;  %v1201_v1 = vsel %vm542_vm0, %v2405_v11, %v1200_v51  ;;  %v1624_v11 = vrot.slane %v3082_v10, 4 }
 0x21b   :  { %v837_v48 = vperm.slane %v829_v36, %v2397_v7  ;;  %v3867_v36 = vld [vmem:[#allocation8_spill] sm:$0xff] }
 0x21c   :  { %1749 = vrot.lane.b32.xlu0 %v2580_v34, %s2240_s22  ;;  %v853_v34 = vsel %vm542_vm0, %v3009_v57, %v852_v22  ;;  %v1625_v9 = vsel %vm542_vm0, %v3078_v58, %v1624_v11  ;;  %v3866_v22 = vld [vmem:[#allocation41_spill] sm:$0xff] }
 0x21d   :  { %v861_v54 = vperm.slane %v853_v34, %v2397_v7  ;;  %v876_v46 = vrot.slane %v837_v48, 4  ;;  %v3202_v20 = vperm.slane %v1625_v9, %v2397_v7  ;;  %v1116_v34 = vrot.slane %v3867_v36, 4 }
 0x21f   :  { %v874_v57 = vrot.slane %v861_v54, 4  ;;  %v877_v56 = vsel %vm542_vm0, %v861_v54, %v876_v46  ;;  %v3869_v46 = vld [vmem:[#allocation39_spill] sm:$0xff] }
 0x220   :  { %1735 = vrot.lane.b32.xlu1 %v1095_v25, %s2239_s21  ;;  %v1400_v25 = vrot.slane %v3866_v22, 4 }
 0x221   :  { %v875_v53 = vsel %vm542_vm0, %v874_v57, %v837_v48  ;;  %v1650_v48 = vrot.slane %v3202_v20, 4  ;;  %v1377_v57 = vsel %vm542_vm0, %v3869_v46, %v1376_v27 }
 0x222   :  { %1775 = vrot.lane.b32.xlu2 %v1099_v31, %s2241_s23  ;;  %v3868_v31 = vld [vmem:[#allocation10_spill] sm:$0xff] }
 0x223   :  { %v1128_v44 = vrot.slane %v3868_v31, 4 }
 0x224   :  { %1755 = vrot.lane.b32.xlu0 %v1097_v0, %s2240_s22  ;;  %v1100_v0 = vrot.slane %v1061_v35, 4 }
 0x226   :  { %v1101_v61 = vsel %vm542_vm0, %v3132_v28, %v1100_v0  ;;  %v3880_v0 = vld [vmem:[#allocation19_spill] sm:$0xff] }
 0x228   :  { %1751 = vrot.lane.b32.xlu1 %v873_v4, %s2240_s22  ;;  %v3222_v4 = vperm.slane %v2981_v24, %v2397_v7  ;;  %v1648_v24 = vrot.slane %v3100_v14, 4 }
 0x22a   :  { %1791 = vrot.lane.b32.xlu2 %v877_v56, %s2242_s24  ;;  %v3870_v56 = vld [vmem:[#allocation38_spill] sm:$0xff]  ;;  %v1651_v28 = vsel %vm542_vm0, %v1650_v48, %v3222_v4  ;;  %v1228_v48 = vrot.slane %v3880_v0, 4 }
 0x22b   :  { %v1401_v35 = vsel %vm542_vm0, %v3870_v56, %v1400_v25 }
 0x22c   :  { %1771 = vrot.lane.b32.xlu0 %v875_v53, %s2241_s23  ;;  %v3871_v53 = vld [vmem:[#allocation6_spill] sm:$0xff] }
 0x22d   :  { %v1117_v51 = vsel %vm542_vm0, %v3871_v53, %v1116_v34 }
 0x22e   :  { %v3245_v9 = vperm.slane %v1117_v51, %v2368_v52 }
 0x230   :  { %1767 = vrot.lane.b32.xlu1 %v2500_v47, %s2241_s23  ;;  %v1314_v47 = vrot.slane %v3180_v15, 4  ;;  %v1162_v36 = vrot.slane %v3245_v9, 4 }
 0x232   :  { %1807 = vrot.lane.b32.xlu2 %v1201_v1, %s2236_s0  ;;  %v3872_v1 = vld [vmem:[#allocation3_spill] sm:$0xff] }
 0x233   :  { %v1129_v40 = vsel %vm542_vm0, %v3872_v1, %v1128_v44 }
 0x234   :  { %1787 = vrot.lane.b32.xlu0 %v2496_v26, %s2242_s24  ;;  %v1265_v26 = vsel %vm542_vm0, %v3859_v33, %v1264_v45  ;;  %v1176_v45 = vrot.slane %v3874_v39, 4  ;;  %v1649_v33 = vsel %vm542_vm0, %v3091_v49, %v1648_v24  ;;  %v3248_v14 = vperm.slane %v1129_v40, %v2368_v52  ;;  %v3877_v49 = vld [vmem:[#allocation4_spill] sm:$0xff]  ;;  %v3883_v40 = vld [vmem:[#allocation27_spill] sm:$0xff] }
 0x235   :  { %v3194_v6 = vperm.slane %v1265_v26, %v2397_v7  ;;  %v1385_v26 = vperm.slane %v1377_v57, %v2397_v7  ;;  %v3882_v57 = vld [vmem:[#allocation22_spill] sm:$0xff] }
 0x236   :  { %v1252_v56 = vrot.slane %v3882_v57, 4 }
 0x237   :  { %v1315_v10 = vsel %vm542_vm0, %v1314_v47, %v3194_v6  ;;  %v1409_v47 = vperm.slane %v1401_v35, %v2397_v7  ;;  %v1428_v27 = vrot.slane %v1385_v26, 4 }
 0x238   :  { %1773 = vrot.lane.b32.xlu1 %v2882_v43, %s2241_s23  ;;  %v3860_v43 = vld [vmem:[#allocation13_spill] sm:$0xff] }
 0x239   :  { %v1140_v59 = vrot.slane %v3860_v43, 4  ;;  %v3875_v43 = vld [vmem:[#allocation14_spill] sm:$0xff]  ;;  %v1426_v22 = vrot.slane %v1409_v47, 4  ;;  %v1429_v34 = vsel %vm542_vm0, %v1409_v47, %v1428_v27 }
 0x23a   :  { %1813 = vrot.lane.b32.xlu2 %v2923_v3, %s2236_s0  ;;  %v3861_v3 = vld [vmem:[#allocation23_spill] sm:$0xff] }
 0x23b   :  { %v1141_v58 = vsel %vm542_vm0, %v3863_v38, %v1140_v59  ;;  %v1177_v59 = vsel %vm542_vm0, %v3875_v43, %v1176_v45  ;;  %v3878_v38 = vld [vmem:[#allocation15_spill] sm:$0xff]  ;;  %v1427_v35 = vsel %vm542_vm0, %v1426_v22, %v1385_v26  ;;  %v3885_v45 = vld [vmem:[#allocation5_spill] sm:$0xff] }
 0x23c   :  { %1793 = vrot.lane.b32.xlu0 %v2878_v50, %s2242_s24  ;;  %v3862_v50 = vld [vmem:[#allocation33_spill] sm:$0xff]  ;;  %v3216_v54 = vperm.slane %v1141_v58, %v2368_v52  ;;  %v1152_v58 = vrot.slane %v3878_v38, 4  ;;  %v1185_v25 = vperm.slane %v1177_v59, %v2397_v7 }
 0x23d   :  { %v1312_v13 = vrot.slane %v3862_v50, 4  ;;  %v3887_v59 = vld [vmem:[#allocation21_spill] sm:$0xff] }
 0x23e   :  { %v1186_v11 = vrot.slane %v3216_v54, 4  ;;  %v1202_v53 = vrot.slane %v1185_v25, 4  ;;  %v3889_v22 = vld [vmem:[#allocation9_spill] sm:$0xff] }
 0x23f   :  { %v1313_v16 = vsel %vm542_vm0, %v3864_v19, %v1312_v13  ;;  %v1105_v13 = vsel %vm542_vm0, %v3877_v49, %v1104_v8  ;;  %v3884_v8 = vld [vmem:[#allocation18_spill] sm:$0xff] }
 0x240   :  { %1789 = vrot.lane.b32.xlu1 %v3861_v3, %s2242_s24  ;;  %v3252_v3 = vpop.permute.xlu2 %1709  ;;  %v1187_v19 = vsel %vm542_vm0, %v1186_v11, %v3248_v14  ;;  %v3271_v44 = vperm.slane %v1105_v13, %v2368_v52  ;;  %v1216_v39 = vrot.slane %v3884_v8, 4  ;;  %v1229_v11 = vsel %vm542_vm0, %v3885_v45, %v1228_v48 }
 0x241   :  { %v3268_v31 = vperm.slane %v1187_v19, %v2397_v7  ;;  %v3303_v49 = vperm.slane %v1229_v11, %v2368_v52  ;;  %v1588_v13 = vrot.slane %v2953_v60, 4 }
 0x242   :  { %1829 = vrot.lane.b32.xlu2 %v1315_v10, %s2237_s19  ;;  %v3876_v10 = vld [vmem:[#allocation44_spill] sm:$0xff]  ;;  %v1163_v1 = vsel %vm542_vm0, %v1162_v36, %v3271_v44  ;;  %v1364_v36 = vrot.slane %v3889_v22, 4 }
 0x243   :  { %v1424_v50 = vrot.slane %v3876_v10, 4  ;;  %v1206_v62 = vrot.slane %v3268_v31, 4  ;;  %v3294_v43 = vperm.slane %v1163_v1, %v2397_v7  ;;  %v1217_v10 = vsel %vm542_vm0, %v3887_v59, %v1216_v39  ;;  %v3893_v39 = vld [vmem:[#allocation35_spill] sm:$0xff] }
 0x244   :  { %1809 = vrot.lane.b32.xlu0 %v1313_v16, %s2236_s0  ;;  %v3879_v16 = vld [vmem:[#allocation43_spill] sm:$0xff]  ;;  %v3310_v19 = vperm.slane %v1217_v10, %v2368_v52  ;;  %v1274_v60 = vrot.slane %v3303_v49, 4  ;;  %v1589_v48 = vsel %vm542_vm0, %v3063_v29, %v1588_v13  ;;  %v1576_v1 = vrot.slane %v2407_v12, 4  ;;  %v3362_v13 = vpop.permute.xlu0 %1689 }
 0x245   :  { %v1425_v41 = vsel %vm542_vm0, %v3879_v16, %v1424_v50  ;;  %v1207_v38 = vsel %vm542_vm0, %v1206_v62, %v3294_v43  ;;  %v3888_v16 = vld [vmem:[#allocation25_spill] sm:$0xff] }
 0x248   :  { %1795 = vrot.lane.b32.xlu1 %v1101_v61, %s2242_s24  ;;  %v3881_v61 = vld [vmem:[#allocation12_spill] sm:$0xff] }
 0x249   :  { %v1153_v46 = vsel %vm542_vm0, %v3881_v61, %v1152_v58 }
 0x24a   :  { %1835 = vrot.lane.b32.xlu2 %v1651_v28, %s2237_s19  ;;  %v1253_v28 = vsel %vm542_vm0, %v3883_v40, %v1252_v56  ;;  %v1161_v24 = vperm.slane %v1153_v46, %v2397_v7  ;;  %v1275_v46 = vsel %vm542_vm0, %v1274_v60, %v3310_v19  ;;  %v3891_v56 = vld [vmem:[#allocation37_spill] sm:$0xff]  ;;  %v3892_v40 = vld [vmem:[#allocation26_spill] sm:$0xff] }
 0x24b   :  { %v3299_v50 = vperm.slane %v1253_v28, %v2368_v52  ;;  %v1340_v28 = vrot.slane %v3892_v40, 4  ;;  %v1281_v62 = vperm.slane %v1275_v46, %v2397_v7 }
 0x24c   :  { %1815 = vrot.lane.b32.xlu0 %v1649_v33, %s2236_s0  ;;  %v3886_v33 = vld [vmem:[#allocation20_spill] sm:$0xff]  ;;  %v1203_v47 = vsel %vm542_vm0, %v1202_v53, %v1161_v24  ;;  %v1204_v58 = vrot.slane %v1161_v24, 4  ;;  %v3332_v53 = vperm.slane %v1589_v48, %v2368_v52  ;;  %v3340_v24 = vpop.permute.xlu1 %1669 }
 0x24d   :  { %v1240_v26 = vrot.slane %v3886_v33, 4 }
 0x24e   :  { %v1205_v27 = vsel %vm542_vm0, %v1185_v25, %v1204_v58  ;;  %v3890_v25 = vld [vmem:[#allocation40_spill] sm:$0xff]  ;;  %v1634_v12 = vrot.slane %v3332_v53, 4 }
 0x24f   :  { %v1352_v57 = vrot.slane %v3890_v25, 4 }
 0x250   :  { %1811 = vrot.lane.b32.xlu1 %v1425_v41, %s2236_s0  ;;  %v1241_v41 = vsel %vm542_vm0, %v3888_v16, %v1240_v26 }
 0x251   :  { %v3324_v61 = vperm.slane %v1241_v41, %v2368_v52  ;;  %v1353_v45 = vsel %vm542_vm0, %v3893_v39, %v1352_v57 }
 0x252   :  { %1851 = vrot.lane.b32.xlu2 %v1429_v34, %s2238_s20  ;;  %v1298_v34 = vrot.slane %v3299_v50, 4  ;;  %v1361_v59 = vperm.slane %v1353_v45, %v2368_v52 }
 0x254   :  { %v3279_v51 = vpop.permute.xlu2 %1715  ;;  %1831 = vrot.lane.b32.xlu0 %v1427_v35, %s2237_s19  ;;  %v1365_v35 = vsel %vm542_vm0, %v3891_v56, %v1364_v36  ;;  %v1299_v29 = vsel %vm542_vm0, %v1298_v34, %v3324_v61  ;;  %v1412_v60 = vrot.slane %v1361_v59, 4 }
 0x255   :  { %v1373_v8 = vperm.slane %v1365_v35, %v2368_v52  ;;  %v1305_v11 = vperm.slane %v1299_v29, %v2397_v7 }
 0x257   :  { %v1410_v16 = vrot.slane %v1373_v8, 4 }
 0x258   :  { %1827 = vrot.lane.b32.xlu1 %v1203_v47, %s2237_s19  ;;  %v1316_v47 = vrot.slane %v3194_v6, 4 }
 0x259   :  { %v1411_v56 = vsel %vm542_vm0, %v1410_v16, %v1361_v59  ;;  %v1164_v59 = vrot.slane %v3271_v44, 4  ;;  %v1188_v16 = vrot.slane %v3248_v14, 4 }
 0x25a   :  { %1867 = vrot.lane.b32.xlu2 %v1207_v38, %s2239_s21  ;;  %v3895_v38 = vld [vmem:[#allocation36_spill] sm:$0xff]  ;;  %v1317_v41 = vsel %vm542_vm0, %v3180_v15, %v1316_v47  ;;  %v1617_v15 = vperm.slane %v2978_v23, %v2397_v7  ;;  %v1417_v39 = vperm.slane %v1411_v56, %v2397_v7 }
 0x25b   :  { %v1341_v58 = vsel %vm542_vm0, %v3895_v38, %v1340_v28 }
 0x25c   :  { %v3317_v0 = vpop.permute.xlu2 %1731  ;;  %1847 = vrot.lane.b32.xlu0 %v1205_v27, %s2238_s20  ;;  %v3896_v27 = vld [vmem:[#allocation29_spill] sm:$0xff]  ;;  %v1349_v34 = vperm.slane %v1341_v58, %v2368_v52  ;;  %v1656_v23 = vrot.slane %v1617_v15, 4  ;;  %v1430_v47 = vrot.slane %v1417_v39, 4 }
 0x25e   :  { %v1386_v40 = vrot.slane %v1349_v34, 4 }
 0x260   :  { %1833 = vrot.lane.b32.xlu1 %v2942_v5, %s2237_s19  ;;  %v1577_v5 = vsel %vm542_vm0, %v2959_v32, %v1576_v1  ;;  %v1320_v32 = vrot.slane %v1281_v62, 4  ;;  %v1652_v1 = vrot.slane %v3222_v4, 4 }
 0x261   :  { %v3360_v10 = vperm.slane %v1577_v5, %v2368_v52 }
 0x262   :  { %1873 = vrot.lane.b32.xlu2 %v2927_v42, %s2239_s21  ;;  %v3894_v42 = vld [vmem:[#allocation7_spill] sm:$0xff]  ;;  %v1321_v36 = vsel %vm542_vm0, %v1305_v11, %v1320_v32  ;;  %v1653_v45 = vsel %vm542_vm0, %v3202_v20, %v1652_v1 }
 0x263   :  { %v1328_v26 = vrot.slane %v3894_v42, 4  ;;  %v1635_v6 = vsel %vm542_vm0, %v1634_v12, %v3360_v10 }
 0x264   :  { %v3352_v33 = vpop.permute.xlu2 %1747  ;;  %1853 = vrot.lane.b32.xlu0 %v2933_v2, %s2238_s20  ;;  %v1318_v2 = vrot.slane %v1305_v11, 4  ;;  %v1641_v57 = vperm.slane %v1635_v6, %v2397_v7  ;;  %v1165_v6 = vsel %vm542_vm0, %v3245_v9, %v1164_v59 }
 0x265   :  { %v1329_v22 = vsel %vm542_vm0, %v3896_v27, %v1328_v26  ;;  %v1189_v27 = vsel %vm542_vm0, %v3216_v54, %v1188_v16  ;;  %v1173_v9 = vperm.slane %v1165_v6, %v2397_v7 }
 0x266   :  { %v1319_v25 = vsel %vm542_vm0, %v1318_v2, %v1281_v62  ;;  %v1337_v35 = vperm.slane %v1329_v22, %v2368_v52  ;;  %v1654_v5 = vrot.slane %v1641_v57, 4  ;;  %v1657_v11 = vsel %vm542_vm0, %v1641_v57, %v1656_v23 }
 0x267   :  { %v1197_v54 = vperm.slane %v1189_v27, %v2397_v7  ;;  %v3901_v27 = vld [vmem:[#allocation47_spill] sm:$0xff] }
 0x268   :  { %1849 = vrot.lane.b32.xlu1 %v1317_v41, %s2238_s20  ;;  %v1388_v52 = vrot.slane %v1337_v35, 4  ;;  %v1387_v42 = vsel %vm542_vm0, %v1386_v40, %v1337_v35  ;;  %v1655_v26 = vsel %vm542_vm0, %v1654_v5, %v1617_v15  ;;  %v1300_v40 = vrot.slane %v3324_v61, 4 }
 0x269   :  { %v1393_v38 = vperm.slane %v1387_v42, %v2397_v7  ;;  %v1210_v56 = vrot.slane %v1197_v54, 4 }
 0x26a   :  { %1889 = vrot.lane.b32.xlu2 %v1321_v36, %s2240_s22  ;;  %v1676_v48 = vpop.permute.xlu1 %1675  ;;  %v1389_v32 = vsel %vm542_vm0, %v1349_v34, %v1388_v52  ;;  %v1301_v23 = vsel %vm542_vm0, %v3299_v50, %v1300_v40  ;;  %v3898_v52 = vld [vmem:[#allocation46_spill] sm:$0xff] }
 0x26b   :  { %v1947_v46 = vsel %vm1942_vm1, %v3053_v63, %v1676_v48  ;;  %v1413_v63 = vsel %vm542_vm0, %v1373_v8, %v1412_v60  ;;  %v1431_v2 = vsel %vm542_vm0, %v1430_v47, %v1393_v38  ;;  %v3418_v44 = vperm.slane %v1389_v32, %v2397_v7 }
 0x26c   :  { %v3384_v29 = vpop.permute.xlu2 %1753  ;;  %1869 = vrot.lane.b32.xlu0 %v1319_v25, %s2239_s21  ;;  %v3400_v12 = vperm.slane %v1413_v63, %v2397_v7  ;;  %v1432_v36 = vrot.slane %v1393_v38, 4  ;;  %v3897_v63 = vld [vmem:[#allocation24_spill] sm:$0xff]  ;;  %v1309_v5 = vperm.slane %v1301_v23, %v2397_v7  ;;  %v3566_v23 = vld [vmem:[%s3759_s1 + $0x18] sm:$0xff] }
 0x26d   :  { %v1944_v61 = vsel %vm1942_vm1, %v3897_v63, %v3340_v24 }
 0x26e   :  { %v1696_v28 = vpop.permute.xlu0 %1695  ;;  %v1434_v58 = vrot.slane %v3400_v12, 4  ;;  %v1433_v48 = vsel %vm542_vm0, %v1417_v39, %v1432_v36  ;;  %v1322_v42 = vrot.slane %v1309_v5, 4 }
 0x26f   :  { %v1953_v62 = vsel %vm1948_vm2, %v1947_v46, %v1696_v28 }
 0x270   :  { %1855 = vrot.lane.b32.xlu1 %v1653_v45, %s2238_s20  ;;  %v3396_v4 = vsel %vm1954_vm3, %v1953_v62, %v3279_v51  ;;  %v1435_v14 = vsel %vm542_vm0, %v1434_v58, %v3418_v44  ;;  %v1950_v45 = vsel %vm1948_vm2, %v1944_v61, %v3362_v13 }
 0x271   :  { %v1956_v13 = vsel %vm1954_vm3, %v1950_v45, %v3252_v3 }
 0x272   :  { %1895 = vrot.lane.b32.xlu2 %v1657_v11, %s2240_s22  ;;  %v1692_v8 = vpop.permute.xlu1 %1691 }
 0x273   :  { %v1951_v20 = vsel %vm1948_vm2, %v2988_v18, %v1692_v8 }
 0x274   :  { %v3408_v51 = vpop.permute.xlu2 %1769  ;;  %1875 = vrot.lane.b32.xlu0 %v1655_v26, %s2239_s21 }
 0x276   :  { %v1712_v41 = vpop.permute.xlu0 %1711 }
 0x277   :  { %v1957_v18 = vsel %vm1954_vm3, %v1951_v20, %v1712_v41  ;;  %v3899_v20 = vld [vmem:[#allocation48_spill] sm:$0xff] }
 0x278   :  { %1871 = vrot.lane.b32.xlu1 %v1431_v2, %s2239_s21  ;;  %v3427_v22 = vsel %vm1960_vm4, %v1957_v18, %v3317_v0  ;;  %v1208_v0 = vrot.slane %v3294_v43, 4 }
 0x27a   :  { %1911 = vrot.lane.b32.xlu2 %v1435_v14, %s2241_s23  ;;  %v1708_v34 = vpop.permute.xlu1 %1707  ;;  %v1209_v57 = vsel %vm542_vm0, %v3268_v31, %v1208_v0  ;;  %v1211_v31 = vsel %vm542_vm0, %v1210_v56, %v1173_v9 }
 0x27b   :  { %v1955_v60 = vsel %vm1954_vm3, %v2998_v37, %v1708_v34  ;;  %v1212_v37 = vrot.slane %v1173_v9, 4 }
 0x27c   :  { %v3437_v15 = vpop.permute.xlu2 %1775  ;;  %1891 = vrot.lane.b32.xlu0 %v1433_v48, %s2240_s22 }
 0x27d   :  { %v1213_v1 = vsel %vm542_vm0, %v1197_v54, %v1212_v37 }
 0x27e   :  { %v1728_v46 = vpop.permute.xlu0 %1727 }
 0x27f   :  { %v1961_v25 = vsel %vm1960_vm4, %v1955_v60, %v1728_v46  ;;  %v1436_v46 = vrot.slane %v3418_v44, 4 }
 0x280   :  { %1887 = vrot.lane.b32.xlu1 %v1209_v57, %s2240_s22  ;;  %v3447_v35 = vsel %vm1966_vm5, %v1961_v25, %v3352_v33  ;;  %v1276_v33 = vrot.slane %v3310_v19, 4  ;;  %v1636_v19 = vrot.slane %v3360_v10, 4  ;;  %v3900_v10 = vld [vmem:[#allocation17_spill] sm:$0xff] }
 0x282   :  { %1927 = vrot.lane.b32.xlu2 %v1213_v1, %s2242_s24  ;;  %v1714_v43 = vpop.permute.xlu1 %1713  ;;  %v1277_v11 = vsel %vm542_vm0, %v3303_v49, %v1276_v33 }
 0x283   :  { %v1958_v28 = vsel %vm1954_vm3, %v3106_v17, %v1714_v43  ;;  %v1285_v47 = vperm.slane %v1277_v11, %v2397_v7 }
 0x284   :  { %v1792_v39 = vpop.permute.xlu2 %1791  ;;  %1907 = vrot.lane.b32.xlu0 %v1211_v31, %s2241_s23 }
 0x285   :  { %v1323_v32 = vsel %vm542_vm0, %v1322_v42, %v1285_v47  ;;  %v1324_v58 = vrot.slane %v1285_v47, 4 }
 0x286   :  { %v1734_v62 = vpop.permute.xlu0 %1733 }
 0x287   :  { %v1964_v17 = vsel %vm1960_vm4, %v1958_v28, %v1734_v62  ;;  %v1325_v18 = vsel %vm542_vm0, %v1309_v5, %v1324_v58 }
 0x288   :  { %1893 = vrot.lane.b32.xlu1 %v2918_v21, %s2240_s22  ;;  %v3470_v50 = vsel %vm1966_vm5, %v1964_v17, %v3384_v29  ;;  %v1637_v21 = vsel %vm542_vm0, %v3332_v53, %v1636_v19  ;;  %v3495_v53 = vld [vmem:[%s3759_s1 + $0x8] sm:$0xff]  ;;  %v3902_v17 = vld [vmem:[#allocation34_spill] sm:$0xff] }
 0x289   :  { %v1645_v49 = vperm.slane %v1637_v21, %v2397_v7  ;;  %v3903_v21 = vld [vmem:[#allocation45_spill] sm:$0xff] }
 0x28a   :  { %1933 = vrot.lane.b32.xlu2 %v3898_v52, %s2242_s24  ;;  %v1730_v24 = vpop.permute.xlu1 %1729 }
 0x28b   :  { %v1962_v8 = vsel %vm1960_vm4, %v1956_v13, %v1730_v24  ;;  %v1658_v2 = vrot.slane %v1645_v49, 4 }
 0x28c   :  { %v1808_v29 = vpop.permute.xlu2 %1807  ;;  %1913 = vrot.lane.b32.xlu0 %v3899_v20, %s2241_s23 }
 0x28d   :  { %v3486_v26 = vsel %vm1942_vm1, %v3900_v10, %v1808_v29 }
 0x28e   :  { %v1750_v3 = vpop.permute.xlu0 %1749 }
 0x28f   :  { %v1968_v59 = vsel %vm1966_vm5, %v1962_v8, %v1750_v3 }
 0x290   :  { %1909 = vrot.lane.b32.xlu1 %v1323_v32, %s2241_s23  ;;  %v1974_v38 = vsel %vm1972_vm6, %v1968_v59, %v3408_v51  ;;  %v1621_v51 = vperm.slane %v2975_v30, %v2397_v7 }
 0x292   :  { %v1736_v16 = vpop.permute.xlu1 %1735  ;;  %2026 = vrot.lane.b32.xlu2 %v3495_v53, %s2236_s0  ;;  %v1659_v60 = vsel %vm542_vm0, %v1658_v2, %v1621_v51  ;;  %v1660_v9 = vrot.slane %v1621_v51, 4 }
 0x293   :  { %v1965_v41 = vsel %vm1960_vm4, %v3396_v4, %v1736_v16  ;;  %v3517_v4 = vld [vmem:[%s3759_s1 + $0x20] sm:$0xff] }
 0x294   :  { %v1814_v6 = vpop.permute.xlu2 %1813  ;;  %1929 = vrot.lane.b32.xlu0 %v1325_v18, %s2242_s24  ;;  %v1661_v30 = vsel %vm542_vm0, %v1645_v49, %v1660_v9 }
 0x295   :  { %v3508_v14 = vsel %vm1942_vm1, %v3901_v27, %v1814_v6 }
 0x296   :  { %v1756_v36 = vpop.permute.xlu0 %1755 }
 0x297   :  { %v1971_v34 = vsel %vm1966_vm5, %v1965_v41, %v1756_v36 }
 0x298   :  { %1915 = vrot.lane.b32.xlu1 %v1659_v60, %s2241_s23  ;;  %v1977_v48 = vsel %vm1972_vm6, %v1971_v34, %v3437_v15  ;;  %v1437_v15 = vsel %vm542_vm0, %v3400_v12, %v1436_v46  ;;  %v3550_v12 = vld [vmem:[%s3759_s1] sm:$0xff] }
 0x29a   :  { %v1752_v54 = vpop.permute.xlu1 %1751  ;;  %2032 = vrot.lane.b32.xlu2 %v3517_v4, %s2236_s0 }
 0x29b   :  { %v1969_v7 = vsel %vm1966_vm5, %v3427_v22, %v1752_v54  ;;  %v3539_v22 = vld [vmem:[%s3759_s1 + $0x10] sm:$0xff] }
 0x29c   :  { %v1830_v0 = vpop.permute.xlu2 %1829  ;;  %1935 = vrot.lane.b32.xlu0 %v1661_v30, %s2242_s24 }
 0x29e   :  { %v1772_v25 = vpop.permute.xlu0 %1771 }
 0x29f   :  { %v1975_v57 = vsel %vm1972_vm6, %v1969_v7, %v1772_v25 }
 0x2a0   :  { %1931 = vrot.lane.b32.xlu1 %v1437_v15, %s2242_s24  ;;  %v3534_v37 = vsel %vm1978_vm7, %v1975_v57, %v1792_v39 }
 0x2a2   :  { %v1768_v56 = vpop.permute.xlu1 %1767  ;;  %2043 = vrot.lane.b32.xlu2 %v3539_v22, %s2237_s19 }
 0x2a3   :  { %v1973_v44 = vsel %vm1972_vm6, %v3447_v35, %v1768_v56 }
 0x2a4   :  { %v1836_v1 = vpop.permute.xlu2 %1835  ;;  %2028 = vrot.lane.b32.xlu0 %v3539_v22, %s2236_s0 }
 0x2a6   :  { %v1788_v40 = vpop.permute.xlu0 %1787 }
 0x2a7   :  { %v3553_v43 = vsel %vm1978_vm7, %v1973_v44, %v1788_v40 }
 0x2a8   :  { %2024 = vrot.lane.b32.xlu1 %v3550_v12, %s2236_s0 }
 0x2aa   :  { %v1774_v28 = vpop.permute.xlu1 %1773  ;;  %2054 = vrot.lane.b32.xlu2 %v3550_v12, %s2238_s20 }
 0x2ab   :  { %v1976_v35 = vsel %vm1972_vm6, %v3470_v50, %v1774_v28 }
 0x2ac   :  { %v1852_v31 = vpop.permute.xlu2 %1851  ;;  %2039 = vrot.lane.b32.xlu0 %v3550_v12, %s2237_s19 }
 0x2ae   :  { %v1794_v39 = vpop.permute.xlu0 %1793 }
 0x2af   :  { %v3569_v33 = vsel %vm1978_vm7, %v1976_v35, %v1794_v39 }
 0x2b0   :  { %2030 = vrot.lane.b32.xlu1 %v3566_v23, %s2236_s0 }
 0x2b2   :  { %v1790_v63 = vpop.permute.xlu1 %1789  ;;  %2060 = vrot.lane.b32.xlu2 %v3566_v23, %s2238_s20 }
 0x2b3   :  { %v3576_v61 = vsel %vm1978_vm7, %v1974_v38, %v1790_v63 }
 0x2b4   :  { %v1868_v62 = vpop.permute.xlu2 %1867  ;;  %2045 = vrot.lane.b32.xlu0 %v3566_v23, %s2237_s19 }
 0x2b6   :  { %v1810_v45 = vpop.permute.xlu0 %1809 }
 0x2b7   :  { %v1985_v5 = vsel %vm1942_vm1, %v3902_v17, %v1810_v45 }
 0x2b8   :  { %2041 = vrot.lane.b32.xlu1 %v3495_v53, %s2237_s19  ;;  %v1990_v50 = vsel %vm1948_vm2, %v1985_v5, %v1830_v0 }
 0x2ba   :  { %v1796_v19 = vpop.permute.xlu1 %1795  ;;  %2071 = vrot.lane.b32.xlu2 %v3495_v53, %s2239_s21 }
 0x2bb   :  { %v3588_v52 = vsel %vm1978_vm7, %v1977_v48, %v1796_v19 }
 0x2bc   :  { %v1874_v24 = vpop.permute.xlu2 %1873  ;;  %2056 = vrot.lane.b32.xlu0 %v3495_v53, %s2238_s20 }
 0x2be   :  { %v1816_v13 = vpop.permute.xlu0 %1815 }
 0x2bf   :  { %v1988_v11 = vsel %vm1942_vm1, %v3114_v55, %v1816_v13 }
 0x2c0   :  { %2047 = vrot.lane.b32.xlu1 %v3517_v4, %s2237_s19  ;;  %v1993_v8 = vsel %vm1948_vm2, %v1988_v11, %v1836_v1 }
 0x2c2   :  { %v1812_v42 = vpop.permute.xlu1 %1811  ;;  %2077 = vrot.lane.b32.xlu2 %v3517_v4, %s2239_s21 }
 0x2c3   :  { %v1986_v29 = vsel %vm1942_vm1, %v3903_v21, %v1812_v42 }
 0x2c4   :  { %v1890_v20 = vpop.permute.xlu2 %1889  ;;  %2062 = vrot.lane.b32.xlu0 %v3517_v4, %s2238_s20 }
 0x2c6   :  { %v1832_v10 = vpop.permute.xlu0 %1831 }
 0x2c7   :  { %v1991_v47 = vsel %vm1948_vm2, %v1986_v29, %v1832_v10 }
 0x2c8   :  { %2058 = vrot.lane.b32.xlu1 %v3539_v22, %s2238_s20  ;;  %v1996_v55 = vsel %vm1954_vm3, %v1991_v47, %v1852_v31 }
 0x2ca   :  { %v1828_v3 = vpop.permute.xlu1 %1827  ;;  %2088 = vrot.lane.b32.xlu2 %v3539_v22, %s2240_s22 }
 0x2cb   :  { %v1989_v49 = vsel %vm1948_vm2, %v3486_v26, %v1828_v3 }
 0x2cc   :  { %v1896_v59 = vpop.permute.xlu2 %1895  ;;  %2073 = vrot.lane.b32.xlu0 %v3539_v22, %s2239_s21 }
 0x2ce   :  { %v1848_v32 = vpop.permute.xlu0 %1847 }
 0x2cf   :  { %v1994_v38 = vsel %vm1954_vm3, %v1989_v49, %v1848_v32 }
 0x2d0   :  { %2069 = vrot.lane.b32.xlu1 %v3550_v12, %s2239_s21  ;;  %v1999_v58 = vsel %vm1960_vm4, %v1994_v38, %v1868_v62 }
 0x2d2   :  { %v1834_v16 = vpop.permute.xlu1 %1833  ;;  %2099 = vrot.lane.b32.xlu2 %v3550_v12, %s2241_s23 }
 0x2d3   :  { %v1992_v41 = vsel %vm1948_vm2, %v3508_v14, %v1834_v16 }
 0x2d4   :  { %v1912_v26 = vpop.permute.xlu2 %1911  ;;  %2084 = vrot.lane.b32.xlu0 %v3550_v12, %s2240_s22 }
 0x2d6   :  { %v1854_v18 = vpop.permute.xlu0 %1853 }
 0x2d7   :  { %v1997_v2 = vsel %vm1954_vm3, %v1992_v41, %v1854_v18 }
 0x2d8   :  { %2075 = vrot.lane.b32.xlu1 %v3566_v23, %s2239_s21  ;;  %v2002_v6 = vsel %vm1960_vm4, %v1997_v2, %v1874_v24 }
 0x2da   :  { %v1850_v27 = vpop.permute.xlu1 %1849  ;;  %2105 = vrot.lane.b32.xlu2 %v3566_v23, %s2241_s23 }
 0x2db   :  { %v1995_v51 = vsel %vm1954_vm3, %v1990_v50, %v1850_v27 }
 0x2dc   :  { %2090 = vrot.lane.b32.xlu0 %v3566_v23, %s2240_s22  ;;  %v1928_v14 = vpop.permute.xlu2 %1927 }
 0x2de   :  { %v1870_v36 = vpop.permute.xlu0 %1869 }
 0x2df   :  { %v2000_v34 = vsel %vm1960_vm4, %v1995_v51, %v1870_v36 }
 0x2e0   :  { %2086 = vrot.lane.b32.xlu1 %v3495_v53, %s2240_s22  ;;  %v2005_v60 = vsel %vm1966_vm5, %v2000_v34, %v1890_v20 }
 0x2e2   :  { %v1856_v48 = vpop.permute.xlu1 %1855  ;;  %2116 = vrot.lane.b32.xlu2 %v3495_v53, %s2242_s24 }
 0x2e3   :  { %v1998_v9 = vsel %vm1954_vm3, %v1993_v8, %v1856_v48 }
 0x2e4   :  { %2101 = vrot.lane.b32.xlu0 %v3495_v53, %s2241_s23  ;;  %v1934_v7 = vpop.permute.xlu2 %1933 }
 0x2e6   :  { %v1876_v54 = vpop.permute.xlu0 %1875 }
 0x2e7   :  { %v2003_v30 = vsel %vm1960_vm4, %v1998_v9, %v1876_v54 }
 0x2e8   :  { %2092 = vrot.lane.b32.xlu1 %v3517_v4, %s2240_s22  ;;  %v2008_v0 = vsel %vm1966_vm5, %v2003_v30, %v1896_v59 }
 0x2ea   :  { %v1872_v46 = vpop.permute.xlu1 %1871  ;;  %2122 = vrot.lane.b32.xlu2 %v3517_v4, %s2242_s24 }
 0x2eb   :  { %v2001_v25 = vsel %vm1960_vm4, %v1996_v55, %v1872_v46 }
 0x2ec   :  { %2107 = vrot.lane.b32.xlu0 %v3517_v4, %s2241_s23  ;;  %v2027_v56 = vpop.permute.xlu2 %2026 }
 0x2ee   :  { %v1892_v57 = vpop.permute.xlu0 %1891 }
 0x2ef   :  { %v2006_v15 = vsel %vm1966_vm5, %v2001_v25, %v1892_v57  ;;  %v2130_v25 = vsel %vm1942_vm1, %v3495_v53, %v2027_v56 }
 0x2f0   :  { %2103 = vrot.lane.b32.xlu1 %v3539_v22, %s2241_s23  ;;  %v2011_v44 = vsel %vm1972_vm6, %v2006_v15, %v1912_v26 }
 0x2f2   :  { %v1888_v1 = vpop.permute.xlu1 %1887 }
 0x2f3   :  { %v2004_v40 = vsel %vm1966_vm5, %v1999_v58, %v1888_v1 }
 0x2f4   :  { %2118 = vrot.lane.b32.xlu0 %v3539_v22, %s2242_s24  ;;  %v2033_v39 = vpop.permute.xlu2 %2032 }
 0x2f6   :  { %v1908_v28 = vpop.permute.xlu0 %1907 }
 0x2f7   :  { %v2009_v35 = vsel %vm1972_vm6, %v2004_v40, %v1908_v28 }
 0x2f8   :  { %2114 = vrot.lane.b32.xlu1 %v3550_v12, %s2242_s24  ;;  %v3661_v31 = vsel %vm1978_vm7, %v2009_v35, %v1928_v14 }
 0x2fa   :  { %v1894_v63 = vpop.permute.xlu1 %1893 }
 0x2fb   :  { %v2007_v62 = vsel %vm1966_vm5, %v2002_v6, %v1894_v63 }
 0x2fc   :  { %v2044_v24 = vpop.permute.xlu2 %2043 }
 0x2fe   :  { %v1914_v45 = vpop.permute.xlu0 %1913 }
 0x2ff   :  { %v2012_v17 = vsel %vm1972_vm6, %v2007_v62, %v1914_v45  ;;  %v2133_v62 = vsel %vm1942_vm1, %v3517_v4, %v2033_v39 }
 0x300   :  { %2120 = vrot.lane.b32.xlu1 %v3566_v23, %s2242_s24  ;;  %v3668_v5 = vsel %vm1978_vm7, %v2012_v17, %v1934_v7 }
 0x302   :  { %v1910_v50 = vpop.permute.xlu1 %1909 }
 0x303   :  { %v2010_v19 = vsel %vm1972_vm6, %v2005_v60, %v1910_v50 }
 0x304   :  { %v2055_v21 = vpop.permute.xlu2 %2054 }
 0x306   :  { %v1930_v13 = vpop.permute.xlu0 %1929 }
 0x307   :  { %v2015_v11 = vsel %vm1978_vm7, %v2010_v19, %v1930_v13 }
 0x30a   :  { %v1916_v8 = vpop.permute.xlu1 %1915 }
 0x30b   :  { %v2013_v42 = vsel %vm1972_vm6, %v2008_v0, %v1916_v8 }
 0x30c   :  { %v2061_v49 = vpop.permute.xlu2 %2060 }
 0x30e   :  { %v1936_v29 = vpop.permute.xlu0 %1935 }
 0x30f   :  { %v2018_v20 = vsel %vm1978_vm7, %v2013_v42, %v1936_v29 }
 0x312   :  { %v1932_v10 = vpop.permute.xlu1 %1931 }
 0x313   :  { %v3675_v47 = vsel %vm1978_vm7, %v2011_v44, %v1932_v10 }
 0x314   :  { %v2072_v26 = vpop.permute.xlu2 %2071 }
 0x316   :  { %v2029_v55 = vpop.permute.xlu0 %2028 }
 0x317   :  { %v2131_v3 = vsel %vm1942_vm1, %v3539_v22, %v2029_v55 }
 0x318   :  { %v2136_v59 = vsel %vm1948_vm2, %v2131_v3, %v2044_v24 }
 0x31a   :  { %v2025_v32 = vpop.permute.xlu1 %2024 }
 0x31b   :  { %v2129_v38 = vsel %vm1942_vm1, %v3550_v12, %v2025_v32 }
 0x31c   :  { %v2078_v14 = vpop.permute.xlu2 %2077 }
 0x31e   :  { %v2040_v58 = vpop.permute.xlu0 %2039 }
 0x31f   :  { %v2134_v16 = vsel %vm1948_vm2, %v2129_v38, %v2040_v58 }
 0x320   :  { %v2139_v41 = vsel %vm1954_vm3, %v2134_v16, %v2055_v21 }
 0x322   :  { %v2031_v18 = vpop.permute.xlu1 %2030 }
 0x323   :  { %v2132_v2 = vsel %vm1942_vm1, %v3566_v23, %v2031_v18 }
 0x324   :  { %v2089_v34 = vpop.permute.xlu2 %2088 }
 0x326   :  { %v2046_v6 = vpop.permute.xlu0 %2045 }
 0x327   :  { %v2137_v22 = vsel %vm1948_vm2, %v2132_v2, %v2046_v6 }
 0x328   :  { %v3688_v27 = vsel %vm1954_vm3, %v2137_v22, %v2061_v49 }
 0x32a   :  { %v2042_v51 = vpop.permute.xlu1 %2041 }
 0x32b   :  { %v2135_v57 = vsel %vm1948_vm2, %v2130_v25, %v2042_v51 }
 0x32c   :  { %v2100_v54 = vpop.permute.xlu2 %2099 }
 0x32e   :  { %v2057_v36 = vpop.permute.xlu0 %2056 }
 0x32f   :  { %v2140_v15 = vsel %vm1954_vm3, %v2135_v57, %v2057_v36 }
 0x330   :  { %v2145_v40 = vsel %vm1960_vm4, %v2140_v15, %v2072_v26 }
 0x332   :  { %v2048_v12 = vpop.permute.xlu1 %2047 }
 0x333   :  { %v2138_v53 = vsel %vm1948_vm2, %v2133_v62, %v2048_v12 }
 0x334   :  { %v2106_v0 = vpop.permute.xlu2 %2105 }
 0x336   :  { %v2063_v60 = vpop.permute.xlu0 %2062 }
 0x337   :  { %v2143_v50 = vsel %vm1954_vm3, %v2138_v53, %v2063_v60 }
 0x338   :  { %v2148_v4 = vsel %vm1960_vm4, %v2143_v50, %v2078_v14 }
 0x33a   :  { %v2059_v48 = vpop.permute.xlu1 %2058 }
 0x33b   :  { %v2141_v8 = vsel %vm1954_vm3, %v2136_v59, %v2059_v48 }
 0x33c   :  { %v2117_v1 = vpop.permute.xlu2 %2116 }
 0x33e   :  { %v2074_v9 = vpop.permute.xlu0 %2073 }
 0x33f   :  { %v2146_v29 = vsel %vm1960_vm4, %v2141_v8, %v2074_v9 }
 0x340   :  { %v2151_v55 = vsel %vm1966_vm5, %v2146_v29, %v2089_v34 }
 0x342   :  { %v2070_v7 = vpop.permute.xlu1 %2069 }
 0x343   :  { %v2144_v3 = vsel %vm1960_vm4, %v2139_v41, %v2070_v7 }
 0x344   :  { %v2123_v39 = vpop.permute.xlu2 %2122 }
 0x346   :  { %v2085_v30 = vpop.permute.xlu0 %2084 }
 0x34a   :  { %v2076_v46 = vpop.permute.xlu1 %2075 }
 0x34e   :  { %v2091_v23 = vpop.permute.xlu0 %2090 }
 0x352   :  { %v2087_v44 = vpop.permute.xlu1 %2086 }
 0x353   :  { %v2150_v28 = vsel %vm1966_vm5, %v2145_v40, %v2087_v44 }
 0x356   :  { %v2102_v35 = vpop.permute.xlu0 %2101 }
 0x357   :  { %v2155_v63 = vsel %vm1972_vm6, %v2150_v28, %v2102_v35 }
 0x358   :  { %v2160_v45 = vsel %vm1978_vm7, %v2155_v63, %v2117_v1 }
 0x359   :  { %v2166_v56 = vmul.f32 %v2160_v45, %v3576_v61  ;;  %v2167_v17 = vmul.f32 %v2160_v45, %v2015_v11 }
 0x35a   :  { %v2093_v19 = vpop.permute.xlu1 %2092 }
 0x35b   :  { %2176 = vst [vmem:[%s3760_s2 + $0x10] sm:$0xff] %v2166_v56  ;;  %v2153_v24 = vsel %vm1966_vm5, %v2148_v4, %v2093_v19 }
 0x35c   :  { %2177 = vst [vmem:[%s3760_s2 + $0x18] sm:$0xff] %v2167_v17 }
 0x35e   :  { %v2108_v13 = vpop.permute.xlu0 %2107 }
 0x35f   :  { %v2158_v61 = vsel %vm1972_vm6, %v2153_v24, %v2108_v13 }
 0x360   :  { %v2163_v11 = vsel %vm1978_vm7, %v2158_v61, %v2123_v39 }
 0x361   :  { %v2172_v42 = vmul.f32 %v2163_v11, %v3588_v52  ;;  %v2173_v21 = vmul.f32 %v2163_v11, %v2018_v20  ;;  %v2149_v52 = vsel %vm1966_vm5, %v2144_v3, %v2085_v30 }
 0x362   :  { %v2104_v10 = vpop.permute.xlu1 %2103  ;;  %v2154_v58 = vsel %vm1972_vm6, %v2149_v52, %v2100_v54 }
 0x363   :  { %2182 = vst [vmem:[%s3760_s2 + $0x40] sm:$0xff] %v2172_v42  ;;  %v2156_v49 = vsel %vm1972_vm6, %v2151_v55, %v2104_v10 }
 0x364   :  { %2183 = vst [vmem:[%s3760_s2 + $0x48] sm:$0xff] %v2173_v21 }
 0x366   :  { %v2119_v59 = vpop.permute.xlu0 %2118 }
 0x367   :  { %v2161_v20 = vsel %vm1978_vm7, %v2156_v49, %v2119_v59 }
 0x368   :  { %v2168_v32 = vmul.f32 %v2161_v20, %v3534_v37  ;;  %v2169_v38 = vmul.f32 %v2161_v20, %v3675_v47  ;;  %v2147_v37 = vsel %vm1960_vm4, %v3688_v27, %v2076_v46 }
 0x369   :  { %v2152_v47 = vsel %vm1966_vm5, %v2147_v37, %v2091_v23 }
 0x36a   :  { %2178 = vst [vmem:[%s3760_s2 + $0x20] sm:$0xff] %v2168_v32  ;;  %v2115_v16 = vpop.permute.xlu1 %2114  ;;  %v2157_v2 = vsel %vm1972_vm6, %v2152_v47, %v2106_v0 }
 0x36b   :  { %2179 = vst [vmem:[%s3760_s2 + $0x28] sm:$0xff] %v2169_v38  ;;  %v2159_v41 = vsel %vm1978_vm7, %v2154_v58, %v2115_v16 }
 0x36c   :  { %v2164_v26 = vmul.f32 %v2159_v41, %v3553_v43  ;;  %v2165_v18 = vmul.f32 %v2159_v41, %v3661_v31 }
 0x36e   :  { %2174 = vst [vmem:[%s3760_s2] sm:$0xff] %v2164_v26 }
 0x36f   :  { %2175 = vst [vmem:[%s3760_s2 + $0x8] sm:$0xff] %v2165_v18 }
 0x372   :  { %v2121_v6 = vpop.permute.xlu1 %2120 }
 0x373   :  { %v2162_v43 = vsel %vm1978_vm7, %v2157_v2, %v2121_v6 }
 0x374   :  { %v2170_v31 = vmul.f32 %v2162_v43, %v3569_v33  ;;  %v2171_v22 = vmul.f32 %v2162_v43, %v3668_v5 }
 0x376   :  { %2180 = vst [vmem:[%s3760_s2 + $0x30] sm:$0xff] %v2170_v31 }
 0x377   :  { %2181 = vst [vmem:[%s3760_s2 + $0x38] sm:$0xff] %v2171_v22 }

</bundles_post_ra>
